<compile_context>
chip_gen: v6e
topology: v6e:2x2x1
jax: 0.10.0
libtpu: 0.0.40
codegen_flags: <defaults>
</compile_context>

<pallas_src>
import jax
import jax.numpy as jnp
import numpy as np
from jax.experimental import pallas as pl
from jax.experimental.pallas import tpu as pltpu


def _sublane_partial_sum(v):
    """Reduce a (tile_b, d) f32 array to an (8, d) sublane-partial sum using
    plain vreg adds only (no cross-sublane XLU reduction)."""
    tb, d = v.shape
    if tb % 8 == 0:
        return v.reshape(tb // 8, 8, d).sum(axis=0)
    # Fallback for odd batch sizes (single full-batch tile): reduce fully and
    # park the result in sublane 0; the JAX epilogue sums over sublanes anyway.
    s = jnp.sum(v, axis=0, keepdims=True)
    return jnp.pad(s, ((0, 7), (0, 0)))


def club_kernel(x1_ref, x2_ref,
                w1_ref, b1_ref, w2_ref, b2_ref, w3_ref, b3_ref,
                stats_ref):
    """Accumulates, per parallel slot, the 7 per-feature statistics needed to
    reconstruct mi / loss exactly in a single pass (no [B,B,D] intermediate):

        stats[0] = sum_i inv_var * mu^2
        stats[1] = sum_i inv_var * mu
        stats[2] = sum_i inv_var
        stats[3] = sum_i x2
        stats[4] = sum_i x2^2
        stats[5] = sum_i pos[i,d]                  (= -0.5 (mu-x2)^2 * inv_var)
        stats[6] = sum_i (mu-x2)^2 * inv_var + logvar

    each kept as an (8, d) sublane-partial sum (f32)."""
    j = pl.program_id(1)          # inner (reduction / "arbitrary") axis
    d = x2_ref.shape[-1]

    @pl.when(j == 0)
    def _init():
        stats_ref[...] = jnp.zeros_like(stats_ref)

    x1 = x1_ref[...]                              # bf16 (streaming dtype)
    x2 = x2_ref[...].astype(jnp.float32)

    # ---- gaussian MLP: Linear->ReLU->Linear->ReLU->Linear->Tanh (merged head)
    h = jnp.dot(x1, w1_ref[...], preferred_element_type=jnp.float32) + b1_ref[...]
    h = jnp.maximum(h, 0.0)
    h = jnp.dot(h.astype(jnp.bfloat16), w2_ref[...],
                preferred_element_type=jnp.float32) + b2_ref[...]
    h = jnp.maximum(h, 0.0)
    out = jnp.tanh(jnp.dot(h.astype(jnp.bfloat16), w3_ref[...],
                           preferred_element_type=jnp.float32) + b3_ref[...])
    mu, logvar = out[:, :d], out[:, d:]           # static lane slice (cheap XLU)

    inv_var = jnp.exp(-logvar)
    diff = mu - x2
    sq = diff * diff * inv_var                    # (mu - x2_i)^2 / exp(logvar)
    ivm = inv_var * mu

    partials = (
        _sublane_partial_sum(ivm * mu),           # A  = Σ inv_var·mu²
        _sublane_partial_sum(ivm),                # B  = Σ inv_var·mu
        _sublane_partial_sum(inv_var),            # C  = Σ inv_var
        _sublane_partial_sum(x2),                 # S1 = Σ x2
        _sublane_partial_sum(x2 * x2),            # S2 = Σ x2²
        _sublane_partial_sum(-0.5 * sq),          # Σ pos
        _sublane_partial_sum(sq + logvar),        # Σ nll
    )
    for k, part in enumerate(partials):           # unrolled; 7 small vreg RMWs
        stats_ref[k] += part


def _choose_tiling(batch):
    """Pick (num_parallel, tile_b): prefer a 2-way parallel split (uses both
    TensorCores on v7x, harmless serial split elsewhere) and the largest tile
    that divides the per-core batch."""
    candidates = (2048, 1024, 512, 256, 128, 64, 32, 16, 8)
    for num_par in (2, 1):
        if batch % num_par:
            continue
        per_core = batch // num_par
        for t in candidates:
            if per_core % t == 0:
                return num_par, t
    return 1, batch   # odd batch: one full-size block (block dim == array dim)


def club_forward(x1, x2, params):
    """Returns (mi_upper_bound, log_likelihood_loss) — matches CLUB.forward / .loss."""
    w1, b1, w2, b2, w3, b3 = params
    B, x1_dim = x1.shape
    d = x2.shape[-1]

    # bf16 streaming path: per-row input + weights in bf16 (native MXU dtype,
    # halves HBM traffic); x2 / biases stay f32 (they feed non-matmul math).
    x1 = x1.astype(jnp.bfloat16)
    w1, w2, w3 = (w.astype(jnp.bfloat16) for w in (w1, w2, w3))

    num_par, tile_b = _choose_tiling(B)
    steps = (B // num_par) // tile_b
    grid = (num_par, steps)

    batch_map = lambda p, j: (p * steps + j, 0)
    const = lambda p, j: (0, 0)      # resident weights/biases: same block always

    stats = pl.pallas_call(
        club_kernel,
        out_shape=jax.ShapeDtypeStruct((num_par, 7, 8, d), jnp.float32),
        grid_spec=pltpu.PrefetchScalarGridSpec(
            num_scalar_prefetch=0,
            grid=grid,
            in_specs=[
                pl.BlockSpec((tile_b, x1_dim), batch_map),
                pl.BlockSpec((tile_b, d), batch_map),
                pl.BlockSpec(w1.shape, const),
                pl.BlockSpec(b1.shape, const),
                pl.BlockSpec(w2.shape, const),
                pl.BlockSpec(b2.shape, const),
                pl.BlockSpec(w3.shape, const),
                pl.BlockSpec(b3.shape, const),
            ],
            # One (7,8,d) partial-stat block per parallel slot; it is revisited
            # across the inner "arbitrary" axis (VMEM-resident accumulator).
            out_specs=pl.BlockSpec((None, 7, 8, d), lambda p, j: (p, 0, 0, 0)),
        ),
        compiler_params=pltpu.CompilerParams(
            dimension_semantics=("parallel", "arbitrary")),
    )(x1, x2, w1, b1, w2, b2, w3, b3)

    # ---- tiny JAX epilogue: cross-core + cross-sublane reduce and finalize ---
    s = jnp.sum(stats, axis=(0, 2))                       # (7, d)
    a, b_, c, s1, s2, pos, ll = s
    e1 = s1 / B                                           # E_j[x2]
    e2 = s2 / B                                           # E_j[x2^2]
    # Σ_i neg[i,d] = -0.5 * Σ_i inv_var[i,d]*(mu[i,d]^2 - 2 mu[i,d] E1_d + E2_d)
    neg = -0.5 * (a - 2.0 * b_ * e1 + c * e2)
    mi = (jnp.sum(pos) - jnp.sum(neg)) / B
    loss = jnp.sum(ll) / B
    return mi, loss


def club_reference(x1, x2, params):
    """Pure-JAX reference with the literal [B,B,D] broadcast (matches PyTorch)."""
    w1, b1, w2, b2, w3, b3 = params
    hp = jax.lax.Precision.HIGHEST
    h = jnp.maximum(jnp.dot(x1, w1, precision=hp) + b1, 0.0)
    h = jnp.maximum(jnp.dot(h, w2, precision=hp) + b2, 0.0)
    out = jnp.tanh(jnp.dot(h, w3, precision=hp) + b3)
    d = x2.shape[-1]
    mu, logvar = out[:, :d], out[:, d:]
    loss = -jnp.mean(jnp.sum(-(mu - x2) ** 2 / jnp.exp(logvar) - logvar, axis=-1))
    pos = -0.5 * (mu - x2) ** 2 / jnp.exp(logvar)
    neg = -0.5 * jnp.mean((mu[:, None, :] - x2[None, :, :]) ** 2, axis=1) / jnp.exp(logvar)
    mi = jnp.mean(jnp.sum(pos, axis=-1) - jnp.sum(neg, axis=-1))
    return mi, loss


def init_params(key, x1_dim, x2_dim, hidden_dims):
    """Deterministic synthetic init (shapes match the nn.Linear stack in CLUB)."""
    dims = [x1_dim] + list(hidden_dims) + [2 * x2_dim]
    params = []
    for i in range(len(dims) - 1):
        key, kw, kb = jax.random.split(key, 3)
        fan_in = dims[i]
        scale = 1.0 / np.sqrt(fan_in)
        w = jax.random.uniform(kw, (dims[i], dims[i + 1]), jnp.float32, -scale, scale)
        b = jax.random.uniform(kb, (1, dims[i + 1]), jnp.float32, -scale, scale)
        params.extend([w, b])
    return tuple(params)


if __name__ == "__main__":
    # B=768 exercises both the 2-way parallel split (grid axis 0) and the
    # multi-step inner accumulation (2 x 3 tiles of 128 rows).
    B, X1_DIM, X2_DIM = 768, 32, 16
    HIDDEN = [32, 32]

    key = jax.random.PRNGKey(0)
    k1, k2, kp = jax.random.split(key, 3)
    x1 = jax.random.normal(k1, (B, X1_DIM), jnp.float32)
    x2 = jax.random.normal(k2, (B, X2_DIM), jnp.float32)
    params = init_params(kp, X1_DIM, X2_DIM, HIDDEN)

    mi, loss = jax.jit(club_forward)(x1, x2, params)
    jax.block_until_ready((mi, loss))

    mi_ref, loss_ref = club_reference(x1, x2, params)
    # Tolerances absorb the bf16 MXU path vs. the Precision.HIGHEST f32 reference.
    np.testing.assert_allclose(np.asarray(mi), np.asarray(mi_ref), rtol=5e-3, atol=1e-3)
    np.testing.assert_allclose(np.asarray(loss), np.asarray(loss_ref), rtol=5e-3, atol=1e-3)

    print("KERNEL_OK")
</pallas_src>

<mosaic_0001>
module attributes {stable_mosaic.version = 11 : i64} {
  func.func @club_kernel(%arg0: i32, %arg1: i32, %arg2: memref<128x32xbf16, #tpu.memory_space<vmem>>, %arg3: memref<128x16xf32, #tpu.memory_space<vmem>>, %arg4: memref<32x32xbf16, #tpu.memory_space<vmem>>, %arg5: memref<1x32xf32, #tpu.memory_space<vmem>>, %arg6: memref<32x32xbf16, #tpu.memory_space<vmem>>, %arg7: memref<1x32xf32, #tpu.memory_space<vmem>>, %arg8: memref<32x32xbf16, #tpu.memory_space<vmem>>, %arg9: memref<1x32xf32, #tpu.memory_space<vmem>>, %arg10: memref<1x7x8x16xf32, #tpu.memory_space<vmem>>) attributes {dimension_semantics = [#tpu.dimension_semantics<parallel>, #tpu.dimension_semantics<arbitrary>], iteration_bounds = array<i64: 2, 3>, scalar_prefetch = 0 : i64, scratch_operands = 0 : i64, tpu.core_type = #tpu.core_type<tc>, window_params = [{transform_indices = @transform_0, window_bounds = array<i64: 128, 32>}, {transform_indices = @transform_1, window_bounds = array<i64: 128, 16>}, {pipeline_mode = #tpu.pipeline_mode<synchronous>, transform_indices = @transform_2, window_bounds = array<i64: 32, 32>}, {pipeline_mode = #tpu.pipeline_mode<synchronous>, transform_indices = @transform_3, window_bounds = array<i64: 1, 32>}, {pipeline_mode = #tpu.pipeline_mode<synchronous>, transform_indices = @transform_4, window_bounds = array<i64: 32, 32>}, {pipeline_mode = #tpu.pipeline_mode<synchronous>, transform_indices = @transform_5, window_bounds = array<i64: 1, 32>}, {pipeline_mode = #tpu.pipeline_mode<synchronous>, transform_indices = @transform_6, window_bounds = array<i64: 32, 32>}, {pipeline_mode = #tpu.pipeline_mode<synchronous>, transform_indices = @transform_7, window_bounds = array<i64: 1, 32>}, {transform_indices = @transform_8, window_bounds = array<i64: 1, 7, 8, 16>}]} {
    %c0_i32 = arith.constant 0 : i32
    %0 = arith.cmpi eq, %arg1, %c0_i32 : i32
    %1 = arith.extui %0 : i1 to i32
    %c0_i32_0 = arith.constant 0 : i32
    %2 = arith.cmpi ne, %1, %c0_i32_0 : i32
    scf.if %2 {
      %cst_79 = arith.constant 0.000000e+00 : f32
      %97 = vector.broadcast %cst_79 : f32 to vector<7x8x16xf32>
      %c0_80 = arith.constant 0 : index
      %c0_81 = arith.constant 0 : index
      %c0_82 = arith.constant 0 : index
      %c0_83 = arith.constant 0 : index
      %98 = vector.load %arg10[%c0_80, %c0_81, %c0_82, %c0_83] : memref<1x7x8x16xf32, #tpu.memory_space<vmem>>, vector<1x7x8x16xf32>
      %99 = vector.shape_cast %98 : vector<1x7x8x16xf32> to vector<7x8x16xf32>
      %100 = vector.shape_cast %97 : vector<7x8x16xf32> to vector<1x7x8x16xf32>
      tpu.vector_store %arg10[%c0_80, %c0_81, %c0_82, %c0_83], %100 {strides = array<i32>} : memref<1x7x8x16xf32, #tpu.memory_space<vmem>>, vector<1x7x8x16xf32>,
    } else {
    }
    %c0 = arith.constant 0 : index
    %c0_1 = arith.constant 0 : index
    %3 = vector.load %arg2[%c0, %c0_1] : memref<128x32xbf16, #tpu.memory_space<vmem>>, vector<128x32xbf16>
    %c0_2 = arith.constant 0 : index
    %c0_3 = arith.constant 0 : index
    %4 = vector.load %arg3[%c0_2, %c0_3] : memref<128x16xf32, #tpu.memory_space<vmem>>, vector<128x16xf32>
    %c0_4 = arith.constant 0 : index
    %c0_5 = arith.constant 0 : index
    %5 = vector.load %arg4[%c0_4, %c0_5] : memref<32x32xbf16, #tpu.memory_space<vmem>>, vector<32x32xbf16>
    %cst = arith.constant dense<0.000000e+00> : vector<128x32xf32>
    %6 = tpu.matmul %3, %5, %cst {dimension_numbers = #tpu.dot_dimension_numbers<[1], [0], [0], [1], [0, 0, 1, 1], [], []>} : vector<128x32xbf16>, vector<32x32xbf16>, vector<128x32xf32> -> vector<128x32xf32>
    %c0_6 = arith.constant 0 : index
    %c0_7 = arith.constant 0 : index
    %7 = vector.load %arg5[%c0_6, %c0_7] : memref<1x32xf32, #tpu.memory_space<vmem>>, vector<1x32xf32>
    %8 = vector.broadcast %7 : vector<1x32xf32> to vector<128x32xf32>
    %9 = arith.addf %6, %8 : vector<128x32xf32>
    %cst_8 = arith.constant 0.000000e+00 : f32
    %10 = vector.broadcast %cst_8 : f32 to vector<128x32xf32>
    %11 = arith.maximumf %9, %10 : vector<128x32xf32>
    %12 = arith.truncf %11 : vector<128x32xf32> to vector<128x32xbf16>
    %c0_9 = arith.constant 0 : index
    %c0_10 = arith.constant 0 : index
    %13 = vector.load %arg6[%c0_9, %c0_10] : memref<32x32xbf16, #tpu.memory_space<vmem>>, vector<32x32xbf16>
    %cst_11 = arith.constant dense<0.000000e+00> : vector<128x32xf32>
    %14 = tpu.matmul %12, %13, %cst_11 {dimension_numbers = #tpu.dot_dimension_numbers<[1], [0], [0], [1], [0, 0, 1, 1], [], []>} : vector<128x32xbf16>, vector<32x32xbf16>, vector<128x32xf32> -> vector<128x32xf32>
    %c0_12 = arith.constant 0 : index
    %c0_13 = arith.constant 0 : index
    %15 = vector.load %arg7[%c0_12, %c0_13] : memref<1x32xf32, #tpu.memory_space<vmem>>, vector<1x32xf32>
    %16 = vector.broadcast %15 : vector<1x32xf32> to vector<128x32xf32>
    %17 = arith.addf %14, %16 : vector<128x32xf32>
    %cst_14 = arith.constant 0.000000e+00 : f32
    %18 = vector.broadcast %cst_14 : f32 to vector<128x32xf32>
    %19 = arith.maximumf %17, %18 : vector<128x32xf32>
    %20 = arith.truncf %19 : vector<128x32xf32> to vector<128x32xbf16>
    %c0_15 = arith.constant 0 : index
    %c0_16 = arith.constant 0 : index
    %21 = vector.load %arg8[%c0_15, %c0_16] : memref<32x32xbf16, #tpu.memory_space<vmem>>, vector<32x32xbf16>
    %cst_17 = arith.constant dense<0.000000e+00> : vector<128x32xf32>
    %22 = tpu.matmul %20, %21, %cst_17 {dimension_numbers = #tpu.dot_dimension_numbers<[1], [0], [0], [1], [0, 0, 1, 1], [], []>} : vector<128x32xbf16>, vector<32x32xbf16>, vector<128x32xf32> -> vector<128x32xf32>
    %c0_18 = arith.constant 0 : index
    %c0_19 = arith.constant 0 : index
    %23 = vector.load %arg9[%c0_18, %c0_19] : memref<1x32xf32, #tpu.memory_space<vmem>>, vector<1x32xf32>
    %24 = vector.broadcast %23 : vector<1x32xf32> to vector<128x32xf32>
    %25 = arith.addf %22, %24 : vector<128x32xf32>
    %26 = math.tanh %25 : vector<128x32xf32>
    %27 = vector.extract_strided_slice %26 {offsets = [0, 0], sizes = [128, 16], strides = [1, 1]} : vector<128x32xf32> to vector<128x16xf32>
    %28 = vector.extract_strided_slice %26 {offsets = [0, 16], sizes = [128, 16], strides = [1, 1]} : vector<128x32xf32> to vector<128x16xf32>
    %cst_20 = arith.constant 0.000000e+00 : f32
    %29 = vector.broadcast %cst_20 : f32 to vector<128x16xf32>
    %30 = arith.subf %29, %28 : vector<128x16xf32>
    %31 = math.exp %30 : vector<128x16xf32>
    %32 = arith.subf %27, %4 : vector<128x16xf32>
    %33 = arith.mulf %32, %32 : vector<128x16xf32>
    %34 = arith.mulf %33, %31 : vector<128x16xf32>
    %35 = arith.mulf %31, %27 : vector<128x16xf32>
    %36 = arith.mulf %35, %27 : vector<128x16xf32>
    %37 = vector.shape_cast %36 : vector<128x16xf32> to vector<16x8x16xf32>
    %cst_21 = arith.constant dense<0.000000e+00> : vector<8x16xf32>
    %38 = vector.multi_reduction <add>, %37, %cst_21 [0] : vector<16x8x16xf32> to vector<8x16xf32>
    %39 = vector.shape_cast %35 : vector<128x16xf32> to vector<16x8x16xf32>
    %cst_22 = arith.constant dense<0.000000e+00> : vector<8x16xf32>
    %40 = vector.multi_reduction <add>, %39, %cst_22 [0] : vector<16x8x16xf32> to vector<8x16xf32>
    %41 = vector.shape_cast %31 : vector<128x16xf32> to vector<16x8x16xf32>
    %cst_23 = arith.constant dense<0.000000e+00> : vector<8x16xf32>
    %42 = vector.multi_reduction <add>, %41, %cst_23 [0] : vector<16x8x16xf32> to vector<8x16xf32>
    %43 = vector.shape_cast %4 : vector<128x16xf32> to vector<16x8x16xf32>
    %cst_24 = arith.constant dense<0.000000e+00> : vector<8x16xf32>
    %44 = vector.multi_reduction <add>, %43, %cst_24 [0] : vector<16x8x16xf32> to vector<8x16xf32>
    %45 = arith.mulf %4, %4 : vector<128x16xf32>
    %46 = vector.shape_cast %45 : vector<128x16xf32> to vector<16x8x16xf32>
    %cst_25 = arith.constant dense<0.000000e+00> : vector<8x16xf32>
    %47 = vector.multi_reduction <add>, %46, %cst_25 [0] : vector<16x8x16xf32> to vector<8x16xf32>
    %cst_26 = arith.constant -5.000000e-01 : f32
    %48 = vector.broadcast %cst_26 : f32 to vector<128x16xf32>
    %49 = arith.mulf %48, %34 : vector<128x16xf32>
    %50 = vector.shape_cast %49 : vector<128x16xf32> to vector<16x8x16xf32>
    %cst_27 = arith.constant dense<0.000000e+00> : vector<8x16xf32>
    %51 = vector.multi_reduction <add>, %50, %cst_27 [0] : vector<16x8x16xf32> to vector<8x16xf32>
    %52 = arith.addf %34, %28 : vector<128x16xf32>
    %53 = vector.shape_cast %52 : vector<128x16xf32> to vector<16x8x16xf32>
    %cst_28 = arith.constant dense<0.000000e+00> : vector<8x16xf32>
    %54 = vector.multi_reduction <add>, %53, %cst_28 [0] : vector<16x8x16xf32> to vector<8x16xf32>
    %c0_29 = arith.constant 0 : index
    %c0_30 = arith.constant 0 : index
    %c0_31 = arith.constant 0 : index
    %c0_32 = arith.constant 0 : index
    %55 = vector.load %arg10[%c0_29, %c0_30, %c0_31, %c0_32] : memref<1x7x8x16xf32, #tpu.memory_space<vmem>>, vector<1x1x8x16xf32>
    %56 = vector.shape_cast %55 : vector<1x1x8x16xf32> to vector<8x16xf32>
    %57 = arith.addf %56, %38 : vector<8x16xf32>
    %c0_33 = arith.constant 0 : index
    %c0_34 = arith.constant 0 : index
    %c0_35 = arith.constant 0 : index
    %c0_36 = arith.constant 0 : index
    %58 = vector.load %arg10[%c0_33, %c0_34, %c0_35, %c0_36] : memref<1x7x8x16xf32, #tpu.memory_space<vmem>>, vector<1x1x8x16xf32>
    %59 = vector.shape_cast %58 : vector<1x1x8x16xf32> to vector<8x16xf32>
    %60 = vector.shape_cast %57 : vector<8x16xf32> to vector<1x1x8x16xf32>
    tpu.vector_store %arg10[%c0_33, %c0_34, %c0_35, %c0_36], %60 {strides = array<i32>} : memref<1x7x8x16xf32, #tpu.memory_space<vmem>>, vector<1x1x8x16xf32>,
    %c0_37 = arith.constant 0 : index
    %c1 = arith.constant 1 : index
    %c0_38 = arith.constant 0 : index
    %c0_39 = arith.constant 0 : index
    %61 = vector.load %arg10[%c0_37, %c1, %c0_38, %c0_39] : memref<1x7x8x16xf32, #tpu.memory_space<vmem>>, vector<1x1x8x16xf32>
    %62 = vector.shape_cast %61 : vector<1x1x8x16xf32> to vector<8x16xf32>
    %63 = arith.addf %62, %40 : vector<8x16xf32>
    %c0_40 = arith.constant 0 : index
    %c1_41 = arith.constant 1 : index
    %c0_42 = arith.constant 0 : index
    %c0_43 = arith.constant 0 : index
    %64 = vector.load %arg10[%c0_40, %c1_41, %c0_42, %c0_43] : memref<1x7x8x16xf32, #tpu.memory_space<vmem>>, vector<1x1x8x16xf32>
    %65 = vector.shape_cast %64 : vector<1x1x8x16xf32> to vector<8x16xf32>
    %66 = vector.shape_cast %63 : vector<8x16xf32> to vector<1x1x8x16xf32>
    tpu.vector_store %arg10[%c0_40, %c1_41, %c0_42, %c0_43], %66 {strides = array<i32>} : memref<1x7x8x16xf32, #tpu.memory_space<vmem>>, vector<1x1x8x16xf32>,
    %c0_44 = arith.constant 0 : index
    %c2 = arith.constant 2 : index
    %c0_45 = arith.constant 0 : index
    %c0_46 = arith.constant 0 : index
    %67 = vector.load %arg10[%c0_44, %c2, %c0_45, %c0_46] : memref<1x7x8x16xf32, #tpu.memory_space<vmem>>, vector<1x1x8x16xf32>
    %68 = vector.shape_cast %67 : vector<1x1x8x16xf32> to vector<8x16xf32>
    %69 = arith.addf %68, %42 : vector<8x16xf32>
    %c0_47 = arith.constant 0 : index
    %c2_48 = arith.constant 2 : index
    %c0_49 = arith.constant 0 : index
    %c0_50 = arith.constant 0 : index
    %70 = vector.load %arg10[%c0_47, %c2_48, %c0_49, %c0_50] : memref<1x7x8x16xf32, #tpu.memory_space<vmem>>, vector<1x1x8x16xf32>
    %71 = vector.shape_cast %70 : vector<1x1x8x16xf32> to vector<8x16xf32>
    %72 = vector.shape_cast %69 : vector<8x16xf32> to vector<1x1x8x16xf32>
    tpu.vector_store %arg10[%c0_47, %c2_48, %c0_49, %c0_50], %72 {strides = array<i32>} : memref<1x7x8x16xf32, #tpu.memory_space<vmem>>, vector<1x1x8x16xf32>,
    %c0_51 = arith.constant 0 : index
    %c3 = arith.constant 3 : index
    %c0_52 = arith.constant 0 : index
    %c0_53 = arith.constant 0 : index
    %73 = vector.load %arg10[%c0_51, %c3, %c0_52, %c0_53] : memref<1x7x8x16xf32, #tpu.memory_space<vmem>>, vector<1x1x8x16xf32>
    %74 = vector.shape_cast %73 : vector<1x1x8x16xf32> to vector<8x16xf32>
    %75 = arith.addf %74, %44 : vector<8x16xf32>
    %c0_54 = arith.constant 0 : index
    %c3_55 = arith.constant 3 : index
    %c0_56 = arith.constant 0 : index
    %c0_57 = arith.constant 0 : index
    %76 = vector.load %arg10[%c0_54, %c3_55, %c0_56, %c0_57] : memref<1x7x8x16xf32, #tpu.memory_space<vmem>>, vector<1x1x8x16xf32>
    %77 = vector.shape_cast %76 : vector<1x1x8x16xf32> to vector<8x16xf32>
    %78 = vector.shape_cast %75 : vector<8x16xf32> to vector<1x1x8x16xf32>
    tpu.vector_store %arg10[%c0_54, %c3_55, %c0_56, %c0_57], %78 {strides = array<i32>} : memref<1x7x8x16xf32, #tpu.memory_space<vmem>>, vector<1x1x8x16xf32>,
    %c0_58 = arith.constant 0 : index
    %c4 = arith.constant 4 : index
    %c0_59 = arith.constant 0 : index
    %c0_60 = arith.constant 0 : index
    %79 = vector.load %arg10[%c0_58, %c4, %c0_59, %c0_60] : memref<1x7x8x16xf32, #tpu.memory_space<vmem>>, vector<1x1x8x16xf32>
    %80 = vector.shape_cast %79 : vector<1x1x8x16xf32> to vector<8x16xf32>
    %81 = arith.addf %80, %47 : vector<8x16xf32>
    %c0_61 = arith.constant 0 : index
    %c4_62 = arith.constant 4 : index
    %c0_63 = arith.constant 0 : index
    %c0_64 = arith.constant 0 : index
    %82 = vector.load %arg10[%c0_61, %c4_62, %c0_63, %c0_64] : memref<1x7x8x16xf32, #tpu.memory_space<vmem>>, vector<1x1x8x16xf32>
    %83 = vector.shape_cast %82 : vector<1x1x8x16xf32> to vector<8x16xf32>
    %84 = vector.shape_cast %81 : vector<8x16xf32> to vector<1x1x8x16xf32>
    tpu.vector_store %arg10[%c0_61, %c4_62, %c0_63, %c0_64], %84 {strides = array<i32>} : memref<1x7x8x16xf32, #tpu.memory_space<vmem>>, vector<1x1x8x16xf32>,
    %c0_65 = arith.constant 0 : index
    %c5 = arith.constant 5 : index
    %c0_66 = arith.constant 0 : index
    %c0_67 = arith.constant 0 : index
    %85 = vector.load %arg10[%c0_65, %c5, %c0_66, %c0_67] : memref<1x7x8x16xf32, #tpu.memory_space<vmem>>, vector<1x1x8x16xf32>
    %86 = vector.shape_cast %85 : vector<1x1x8x16xf32> to vector<8x16xf32>
    %87 = arith.addf %86, %51 : vector<8x16xf32>
    %c0_68 = arith.constant 0 : index
    %c5_69 = arith.constant 5 : index
    %c0_70 = arith.constant 0 : index
    %c0_71 = arith.constant 0 : index
    %88 = vector.load %arg10[%c0_68, %c5_69, %c0_70, %c0_71] : memref<1x7x8x16xf32, #tpu.memory_space<vmem>>, vector<1x1x8x16xf32>
    %89 = vector.shape_cast %88 : vector<1x1x8x16xf32> to vector<8x16xf32>
    %90 = vector.shape_cast %87 : vector<8x16xf32> to vector<1x1x8x16xf32>
    tpu.vector_store %arg10[%c0_68, %c5_69, %c0_70, %c0_71], %90 {strides = array<i32>} : memref<1x7x8x16xf32, #tpu.memory_space<vmem>>, vector<1x1x8x16xf32>,
    %c0_72 = arith.constant 0 : index
    %c6 = arith.constant 6 : index
    %c0_73 = arith.constant 0 : index
    %c0_74 = arith.constant 0 : index
    %91 = vector.load %arg10[%c0_72, %c6, %c0_73, %c0_74] : memref<1x7x8x16xf32, #tpu.memory_space<vmem>>, vector<1x1x8x16xf32>
    %92 = vector.shape_cast %91 : vector<1x1x8x16xf32> to vector<8x16xf32>
    %93 = arith.addf %92, %54 : vector<8x16xf32>
    %c0_75 = arith.constant 0 : index
    %c6_76 = arith.constant 6 : index
    %c0_77 = arith.constant 0 : index
    %c0_78 = arith.constant 0 : index
    %94 = vector.load %arg10[%c0_75, %c6_76, %c0_77, %c0_78] : memref<1x7x8x16xf32, #tpu.memory_space<vmem>>, vector<1x1x8x16xf32>
    %95 = vector.shape_cast %94 : vector<1x1x8x16xf32> to vector<8x16xf32>
    %96 = vector.shape_cast %93 : vector<8x16xf32> to vector<1x1x8x16xf32>
    tpu.vector_store %arg10[%c0_75, %c6_76, %c0_77, %c0_78], %96 {strides = array<i32>} : memref<1x7x8x16xf32, #tpu.memory_space<vmem>>, vector<1x1x8x16xf32>,
    return
  }
  func.func @transform_0(%arg0: i32, %arg1: i32) -> (i32, i32) {
    %c3_i32 = arith.constant 3 : i32
    %0 = arith.muli %arg0, %c3_i32 : i32
    %1 = arith.addi %0, %arg1 : i32
    %c0_i32 = arith.constant 0 : i32
    %c0_i32_0 = arith.constant 0 : i32
    return %1, %c0_i32 : i32, i32
  }
  func.func @transform_1(%arg0: i32, %arg1: i32) -> (i32, i32) {
    %c3_i32 = arith.constant 3 : i32
    %0 = arith.muli %arg0, %c3_i32 : i32
    %1 = arith.addi %0, %arg1 : i32
    %c0_i32 = arith.constant 0 : i32
    %c0_i32_0 = arith.constant 0 : i32
    return %1, %c0_i32 : i32, i32
  }
  func.func @transform_2(%arg0: i32, %arg1: i32) -> (i32, i32) {
    %c0_i32 = arith.constant 0 : i32
    %c0_i32_0 = arith.constant 0 : i32
    %c0_i32_1 = arith.constant 0 : i32
    return %c0_i32, %c0_i32_0 : i32, i32
  }
  func.func @transform_3(%arg0: i32, %arg1: i32) -> (i32, i32) {
    %c0_i32 = arith.constant 0 : i32
    %c0_i32_0 = arith.constant 0 : i32
    %c0_i32_1 = arith.constant 0 : i32
    return %c0_i32, %c0_i32_0 : i32, i32
  }
  func.func @transform_4(%arg0: i32, %arg1: i32) -> (i32, i32) {
    %c0_i32 = arith.constant 0 : i32
    %c0_i32_0 = arith.constant 0 : i32
    %c0_i32_1 = arith.constant 0 : i32
    return %c0_i32, %c0_i32_0 : i32, i32
  }
  func.func @transform_5(%arg0: i32, %arg1: i32) -> (i32, i32) {
    %c0_i32 = arith.constant 0 : i32
    %c0_i32_0 = arith.constant 0 : i32
    %c0_i32_1 = arith.constant 0 : i32
    return %c0_i32, %c0_i32_0 : i32, i32
  }
  func.func @transform_6(%arg0: i32, %arg1: i32) -> (i32, i32) {
    %c0_i32 = arith.constant 0 : i32
    %c0_i32_0 = arith.constant 0 : i32
    %c0_i32_1 = arith.constant 0 : i32
    return %c0_i32, %c0_i32_0 : i32, i32
  }
  func.func @transform_7(%arg0: i32, %arg1: i32) -> (i32, i32) {
    %c0_i32 = arith.constant 0 : i32
    %c0_i32_0 = arith.constant 0 : i32
    %c0_i32_1 = arith.constant 0 : i32
    return %c0_i32, %c0_i32_0 : i32, i32
  }
  func.func @transform_8(%arg0: i32, %arg1: i32) -> (i32, i32, i32, i32) {
    %c0_i32 = arith.constant 0 : i32
    %c0_i32_0 = arith.constant 0 : i32
    %c0_i32_1 = arith.constant 0 : i32
    %c0_i32_2 = arith.constant 0 : i32
    return %arg0, %c0_i32, %c0_i32_0, %c0_i32_1 : i32, i32, i32, i32
  }
}

</mosaic_0001>

<bundles_post_ra>
// kernel: club_forward.1
= control target key start
LH: loop header
LB: loop body
LE: loop exit
PB: predicated region body
PF: predicated region fallthrough
CT: control target
= control target key end

     0   :  { %s2010_s27 = smov 0   ;;  %s2012_s28 = smov 0   ;;  %s2686_s0 = inlined_call_operand.vmem [shape: bf16[768,32], index: 0, kind: input, shape index: {}]   ;;  %s2687_s1 = inlined_call_operand.vmem [shape: f32[768,16], index: 1, kind: input, shape index: {}]   ;;  %s2688_s2 = inlined_call_operand.vmem [shape: bf16[32,32], index: 2, kind: input, shape index: {}]   ;;  %s2689_s3 = inlined_call_operand.vmem [shape: f32[1,32], index: 3, kind: input, shape index: {}]   ;;  %s2690_s4 = inlined_call_operand.vmem [shape: bf16[32,32], index: 4, kind: input, shape index: {}]   ;;  %s2691_s5 = inlined_call_operand.vmem [shape: f32[1,32], index: 5, kind: input, shape index: {}]   ;;  %s2692_s6 = inlined_call_operand.vmem [shape: bf16[32,32], index: 6, kind: input, shape index: {}]   ;;  %s2693_s7 = inlined_call_operand.vmem [shape: f32[1,32], index: 7, kind: input, shape index: {}]   ;;  %s2694_s8 = inlined_call_operand.vmem [shape: f32[2,7,8,16], index: 8, kind: output, shape index: {}]  }
   0x1   :  { %s2014_s29 = smov 0   ;;  %s2016_s30 = smov 0  }
   0x2   :  { %s2018_s9 = smov 0  }
   0x3 LB: > { %s27_s10 = sadd.s32 1, %s1952_s29  ;;  %s30_s11 = sadd.s32 1, %s1956_s30  ;;  %s1960_s9 = sphi %s2018_s9, %s18_s9   ;;  %s1956_s30 = sphi %s2016_s30, %s2698_s30   ;;  %s1952_s29 = sphi %s2014_s29, %s2697_s29   ;;  %s1948_s28 = sphi %s2012_s28, %s2696_s28   ;;  %s1944_s27 = sphi %s2010_s27, %s2695_s27  }
   0x4   : > { %p28_p0 = scmp.ge.s32.totalorder %s27_s10, 3  ;;  %p1644_p1 = scmp.ge.s32.totalorder %s1960_s9, 1 }
   0x5   : > { %p302_p2 = scmp.lt.s32.totalorder %s1960_s9, 7 }
   0x6   : > { %s2700_s10 = smov (%p28_p0, %s27_s10), 0  ;;  %s2702_s11 = smov (!%p28_p0, %s30_s11), %s1956_s30 }
   0x7   : > { %p303_p3 = pnand %p1644_p1, %p302_p2  ;;  %p32_p4 = scmp.ge.s32.totalorder %s2702_s11, 2 }
   0x8   : > { %s345_s12 = smul.u32 (!%p303_p3), 3, %s1948_s28  ;;  %p365_p5 = scmp.lt.s32.totalorder (!%p303_p3), %s1948_s28, 1 }
   0x9   : > { %s2704_s11 = smov (%p32_p4, %s2702_s11), 0  ;;  %306 = sbr.rel (%p303_p3) target bundleno = 938 (0x3aa), region = 52 }
   0xa   : > { %s346_s13 = sadd.s32 (!%p303_p3), %s1944_s27, %s345_s12  ;;  %p1650_p7 = scmp.ne.s32.totalorder (!%p303_p3), %s1944_s27, 0 }
   0xb   : > { %s1645_s14 = sshll.u32 (!%p303_p3), %s346_s13, 4 }
   0xc   : > { %p348_p6 = scmp.lt.s32.totalorder (!%p303_p3), %s1645_s14, 95 }
   0xe   : > { %s2706_s28 = smov (!%p365_p5, %s1948_s28), 1  ;;  %s2708_s14 = smov (!%p348_p6, %s1645_s14), 95 }
   0xf   : > { %s1800_s15 = smul.u32 56, %s2706_s28  ;;  %s1646_s16 = sshll.u32 %s2708_s14, 2 }
  0x10   : > { %s1648_s17 = sshll.u32 %s2708_s14, 3  ;;  %s2046_s20 = scalar_lea.vmem %s2686_s0, %s1646_s16 }
  0x11   : > { %s2051_s23 = scalar_lea.vmem %s2687_s1, %s1648_s17  ;;  %s2056_s26 = scalar_lea.vmem %s2694_s8, %s1800_s15 }
  0x12   : > { %374 = sbr.rel (%p1650_p7) target bundleno = 28 (0x1c), region = 56 }
  0x17   : > { %vm375_vm0 = vcmask 130048   ;;  %v1962_v0 = vmov 0.0  }
  0x18   : > { %376 = vst.msk [vmem:[%s2056_s26] sm:$0xff] %vm375_vm0, %v1962_v0  ;;  %377 = vst.msk [vmem:[%s2056_s26 + $0x8] sm:$0xff] %vm375_vm0, %v1962_v0 }
  0x19   : > { %378 = vst.msk [vmem:[%s2056_s26 + $0x10] sm:$0xff] %vm375_vm0, %v1962_v0  ;;  %379 = vst.msk [vmem:[%s2056_s26 + $0x18] sm:$0xff] %vm375_vm0, %v1962_v0 }
  0x1a   : > { %380 = vst.msk [vmem:[%s2056_s26 + $0x20] sm:$0xff] %vm375_vm0, %v1962_v0  ;;  %381 = vst.msk [vmem:[%s2056_s26 + $0x28] sm:$0xff] %vm375_vm0, %v1962_v0 }
  0x1b   : > { %382 = vst.msk [vmem:[%s2056_s26 + $0x30] sm:$0xff] %vm375_vm0, %v1962_v0 }
  0x1c PF: > { %v1844_v1 = vld [vmem:[%s2688_s2 + $0x8] sm:$0xff]   ;;  %v1845_v2 = vld [vmem:[%s2688_s2] sm:$0xff]   ;;  %vm478_vm1 = vcmask 261120   ;;  %v1848_v5 = vld [vmem:[%s2046_s20 + $0x10] sm:$0xff]   ;;  %s1963_s13 = smov 16   ;;  %vm1302_vm2 = vcmask 130048  }
  0x1d   : > { %1736 = vmatprep.subr.bf16.mxu0 %v1844_v1  ;;  %v1846_v3 = vld [vmem:[%s2046_s20] sm:$0xff]   ;;  %1796 = vmatprep.subr.bf16.mxu1 %v1844_v1  ;;  %v1847_v4 = vld [vmem:[%s2046_s20 + $0x8] sm:$0xff]   ;;  %v1852_v8 = vld [vmem:[%s2046_s20 + $0x30] sm:$0xff]   ;;  %s1964_s14 = smov 112   ;;  %vm1208_vm3 = vcmask 261248  }
  0x1e   : > { %1737 = vmatpush3.bf16.msra.mxu0 %v1844_v1  ;;  %1798 = vmatpush3.bf16.msra.mxu1 %v1844_v1  ;;  %v1850_v6 = vld [vmem:[%s2046_s20 + $0x20] sm:$0xff]   ;;  %v1851_v7 = vld [vmem:[%s2046_s20 + $0x28] sm:$0xff]   ;;  %v1849_v10 = vld [vmem:[%s2046_s20 + $0x18] sm:$0xff]  }
  0x1f   : > { %1738 = vmatprep.subr.bf16.mxu0 %v1845_v2  ;;  %1740 = vmatprep.mubr.msk.bf16.mxu0 %vm478_vm1, %v1846_v3  ;;  %v1854_v9 = vld [vmem:[%s2690_s4 + $0x8] sm:$0xff]   ;;  %v1853_v11 = vld [vmem:[%s2046_s20 + $0x38] sm:$0xff]   ;;  %v1855_v12 = vld [vmem:[%s2690_s4] sm:$0xff]  }
  0x20   : > { %1797 = vmatprep.subr.bf16.mxu1 %v1845_v2  ;;  %1748 = vmatprep.mubr.msk.bf16.mxu1 %vm478_vm1, %v1850_v6  ;;  %v1856_v13 = vld [vmem:[%s2692_s6 + $0x8] sm:$0xff]   ;;  %v1651_v18 = vld [vmem:[%s2689_s3] ss:$0 sm:$0xff] }
  0x22   : > { %1739 = vmatpush3.bf16.msra.mxu0 %v1845_v2  ;;  %1799 = vmatpush3.bf16.msra.mxu1 %v1845_v2 }
  0x23   : > { %1756 = vmatprep.subr.bf16.mxu1 %v1854_v9  ;;  %1776 = vmatprep.subr.bf16.mxu0 %v1856_v13 }
  0x25   : > { %1741 = vmatmul.mubr.msk.bf16.vlgmr.msra.gmra.mxu0 %vm478_vm1, %v1847_v4  ;;  %1749 = vmatmul.mubr.msk.bf16.vlgmr.msra.gmra.mxu1 %vm478_vm1, %v1851_v7  ;;  %v1857_v7 = vld [vmem:[%s2692_s6] sm:$0xff]  }
  0x26   : > { %1744 = vmatprep.mubr.msk.bf16.mxu0 %vm478_vm1, %v1848_v5  ;;  %1752 = vmatprep.mubr.msk.bf16.mxu1 %vm478_vm1, %v1852_v8 }
  0x27   : > { %1757 = vmatpush3.bf16.msra.mxu1 %v1854_v9  ;;  %1777 = vmatpush3.bf16.msra.mxu0 %v1856_v13 }
  0x28   : > { %1758 = vmatprep.subr.bf16.mxu1 %v1855_v12  ;;  %1778 = vmatprep.subr.bf16.mxu0 %v1857_v7 }
  0x2b   : > { %1759 = vmatpush3.bf16.msra.mxu1 %v1855_v12  ;;  %1779 = vmatpush3.bf16.msra.mxu0 %v1857_v7 }
  0x2d   : > { %1745 = vmatmul.mubr.msk.bf16.gmra.mxu0 %vm478_vm1, %v1849_v10  ;;  %1753 = vmatmul.mubr.msk.bf16.gmra.mxu1 %vm478_vm1, %v1853_v11  ;;  %v1670_v10 = vld [vmem:[%s2691_s5] ss:$0 sm:$0xff] }
  0xe5   : > { %v1742_v14 = vpop.f32.mrf.mxu0  ;;  %v1750_v15 = vpop.f32.mrf.mxu1 }
  0xe6   : > { %v546_v23 = vadd.f32 %v1742_v14, %v1651_v18  ;;  %v578_v57 = vadd.f32 %v1750_v15, %v1651_v18 }
  0xe7   : > { %v537_v16 = vpop.f32.mrf.mxu0  ;;  %v569_v17 = vpop.f32.mrf.mxu1 }
  0xe8   : > { %v538_v21 = vadd.f32 %v1651_v18, %v537_v16  ;;  %v602_v32 = vmax.f32 %v546_v23, 0.0  ;;  %v570_v36 = vadd.f32 %v1651_v18, %v569_v17  ;;  %v610_v62 = vmax.f32 %v578_v57, 0.0 }
  0xe9   : > { %v1743_v19 = vpop.f32.mrf.mxu0  ;;  %v1751_v20 = vpop.f32.mrf.mxu1 }
  0xea   : > { %v549_v22 = vadd.f32 %v1743_v19, %v1651_v18  ;;  %v600_v30 = vmax.f32 %v538_v21, 0.0  ;;  %v608_v45 = vmax.f32 %v570_v36, 0.0  ;;  %v581_v59 = vadd.f32 %v1751_v20, %v1651_v18 }
  0xeb   : > { %v540_v24 = vpop.f32.mrf.mxu0  ;;  %v572_v25 = vpop.f32.mrf.mxu1 }
  0xec   : > { %v541_v26 = vadd.f32 %v1651_v18, %v540_v24  ;;  %v603_v27 = vmax.f32 %v549_v22, 0.0  ;;  %v573_v37 = vadd.f32 %v1651_v18, %v572_v25  ;;  %v611_v63 = vmax.f32 %v581_v59, 0.0 }
  0xed   : > { %v1746_v28 = vpop.f32.mrf.mxu0  ;;  %v1754_v29 = vpop.f32.mrf.mxu1 }
  0xee   : > { %v601_v31 = vmax.f32 %v541_v26, 0.0  ;;  %v617_v38 = vpack.c.bf16 %v603_v27, %v602_v32  ;;  %v562_v43 = vadd.f32 %v1746_v28, %v1651_v18  ;;  %v609_v47 = vmax.f32 %v573_v37, 0.0 }
  0xef   : > { %v553_v33 = vpop.f32.mrf.mxu0  ;;  %v585_v34 = vpop.f32.mrf.mxu1  ;;  %v621_v1 = vpack.c.bf16 %v611_v63, %v610_v62  ;;  %v594_v2 = vadd.f32 %v1754_v29, %v1651_v18 }
  0xf0   : > { %v616_v35 = vpack.c.bf16 %v601_v31, %v600_v30  ;;  %v554_v41 = vadd.f32 %v1651_v18, %v553_v33  ;;  %v606_v52 = vmax.f32 %v562_v43, 0.0  ;;  %v620_v54 = vpack.c.bf16 %v609_v47, %v608_v45 }
  0xf1   : > { %v1747_v39 = vpop.f32.mrf.mxu0  ;;  %v1755_v40 = vpop.f32.mrf.mxu1  ;;  %v586_v55 = vadd.f32 %v1651_v18, %v585_v34  ;;  %v614_v4 = vmax.f32 %v594_v2, 0.0 }
  0xf2   : > { %v565_v42 = vadd.f32 %v1747_v39, %v1651_v18  ;;  %1760 = vmatprep.mubr.msk.bf16.mxu1 %vm478_vm1, %v616_v35  ;;  %v604_v50 = vmax.f32 %v554_v41, 0.0  ;;  %v597_v3 = vadd.f32 %v1755_v40, %v1651_v18 }
  0xf3   : > { %v556_v44 = vpop.f32.mrf.mxu0  ;;  %1761 = vmatmul.mubr.msk.bf16.vlgmr.msra.gmra.mxu1 %vm478_vm1, %v617_v38  ;;  %v588_v49 = vpop.f32.mrf.mxu1  ;;  %v612_v60 = vmax.f32 %v586_v55, 0.0 }
  0xf4   : > { %v557_v46 = vadd.f32 %v1651_v18, %v556_v44  ;;  %v607_v48 = vmax.f32 %v565_v42, 0.0  ;;  %v589_v56 = vadd.f32 %v1651_v18, %v588_v49  ;;  %v615_v5 = vmax.f32 %v597_v3, 0.0 }
  0xf6   : > { %v605_v51 = vmax.f32 %v557_v46, 0.0  ;;  %v619_v58 = vpack.c.bf16 %v607_v48, %v606_v52  ;;  %v613_v61 = vmax.f32 %v589_v56, 0.0  ;;  %v623_v6 = vpack.c.bf16 %v615_v5, %v614_v4 }
  0xf8   : > { %v618_v53 = vpack.c.bf16 %v605_v51, %v604_v50  ;;  %v622_v0 = vpack.c.bf16 %v613_v61, %v612_v60 }
  0xfa   : > { %1764 = vmatprep.mubr.msk.bf16.mxu1 %vm478_vm1, %v618_v53 }
  0xfb   : > { %1765 = vmatmul.mubr.msk.bf16.gmra.mxu1 %vm478_vm1, %v619_v58 }
  0xfc   : > { %1768 = vmatprep.mubr.msk.bf16.mxu1 %vm478_vm1, %v620_v54 }
 0x103   : > { %1769 = vmatmul.mubr.msk.bf16.gmra.mxu1 %vm478_vm1, %v621_v1  ;;  %v2125_v1 = vld [vmem:[%s2693_s7] ss:$0 sm:$0xff] }
 0x104   : > { %1772 = vmatprep.mubr.msk.bf16.mxu1 %vm478_vm1, %v622_v0 }
 0x10b   : > { %1773 = vmatmul.mubr.msk.bf16.gmra.mxu1 %vm478_vm1, %v623_v6 }
 0x1b3   : > { %v1762_v8 = vpop.f32.mrf.mxu1 }
 0x1b4   : > { %v714_v14 = vadd.f32 %v1762_v8, %v1670_v10 }
 0x1b5   : > { %v705_v9 = vpop.f32.mrf.mxu1 }
 0x1b6   : > { %v706_v12 = vadd.f32 %v1670_v10, %v705_v9  ;;  %v770_v21 = vmax.f32 %v714_v14, 0.0 }
 0x1b7   : > { %v1763_v11 = vpop.f32.mrf.mxu1 }
 0x1b8   : > { %v717_v13 = vadd.f32 %v1763_v11, %v1670_v10  ;;  %v768_v19 = vmax.f32 %v706_v12, 0.0 }
 0x1b9   : > { %v708_v15 = vpop.f32.mrf.mxu1 }
 0x1ba   : > { %v709_v16 = vadd.f32 %v1670_v10, %v708_v15  ;;  %v771_v17 = vmax.f32 %v717_v13, 0.0 }
 0x1bb   : > { %v1766_v18 = vpop.f32.mrf.mxu1 }
 0x1bc   : > { %v769_v20 = vmax.f32 %v709_v16, 0.0  ;;  %v785_v24 = vpack.c.bf16 %v771_v17, %v770_v21  ;;  %v730_v28 = vadd.f32 %v1766_v18, %v1670_v10  ;;  %v2135_v17 = vld [vmem:[%s2051_s23 + $0x10] sm:$0xff] }
 0x1bd   : > { %v721_v22 = vpop.f32.mrf.mxu1 }
 0x1be   : > { %v784_v23 = vpack.c.bf16 %v769_v20, %v768_v19  ;;  %v722_v26 = vadd.f32 %v1670_v10, %v721_v22  ;;  %v774_v35 = vmax.f32 %v730_v28, 0.0  ;;  %v2144_v22 = vld [vmem:[%s2051_s23] sm:$0xff] }
 0x1bf   : > { %v1767_v25 = vpop.f32.mrf.mxu1 }
 0x1c0   : > { %v733_v27 = vadd.f32 %v1767_v25, %v1670_v10  ;;  %1780 = vmatprep.mubr.msk.bf16.mxu0 %vm478_vm1, %v784_v23  ;;  %v772_v33 = vmax.f32 %v722_v26, 0.0 }
 0x1c1   : > { %v724_v29 = vpop.f32.mrf.mxu1  ;;  %1781 = vmatmul.mubr.msk.bf16.vlgmr.msra.gmra.mxu0 %vm478_vm1, %v785_v24 }
 0x1c2   : > { %v725_v30 = vadd.f32 %v1670_v10, %v724_v29  ;;  %v775_v31 = vmax.f32 %v733_v27, 0.0  ;;  %v2156_v27 = vld [vmem:[%s2051_s23 + $0x18] sm:$0xff] }
 0x1c3   : > { %v1770_v32 = vpop.f32.mrf.mxu1 }
 0x1c4   : > { %v773_v34 = vmax.f32 %v725_v30, 0.0  ;;  %v787_v38 = vpack.c.bf16 %v775_v31, %v774_v35  ;;  %v746_v42 = vadd.f32 %v1770_v32, %v1670_v10  ;;  %v2168_v32 = vld [vmem:[%s2051_s23 + $0x8] sm:$0xff] }
 0x1c5   : > { %v737_v36 = vpop.f32.mrf.mxu1 }
 0x1c6   : > { %v786_v37 = vpack.c.bf16 %v773_v34, %v772_v33  ;;  %v738_v40 = vadd.f32 %v1670_v10, %v737_v36  ;;  %v778_v49 = vmax.f32 %v746_v42, 0.0  ;;  %v2190_v42 = vld [vmem:[%s2051_s23 + $0x20] sm:$0xff] }
 0x1c7   : > { %v1771_v39 = vpop.f32.mrf.mxu1 }
 0x1c8   : > { %v749_v41 = vadd.f32 %v1771_v39, %v1670_v10  ;;  %1784 = vmatprep.mubr.msk.bf16.mxu0 %vm478_vm1, %v786_v37  ;;  %v776_v47 = vmax.f32 %v738_v40, 0.0  ;;  %v2180_v37 = vld [vmem:[%s2051_s23 + $0x30] sm:$0xff] }
 0x1c9   : > { %v740_v43 = vpop.f32.mrf.mxu1  ;;  %1785 = vmatmul.mubr.msk.bf16.gmra.mxu0 %vm478_vm1, %v787_v38 }
 0x1ca   : > { %v741_v44 = vadd.f32 %v1670_v10, %v740_v43  ;;  %v779_v45 = vmax.f32 %v749_v41, 0.0 }
 0x1cb   : > { %v1774_v46 = vpop.f32.mrf.mxu1 }
 0x1cc   : > { %v777_v48 = vmax.f32 %v741_v44, 0.0  ;;  %v789_v52 = vpack.c.bf16 %v779_v45, %v778_v49  ;;  %v762_v56 = vadd.f32 %v1774_v46, %v1670_v10  ;;  %v2201_v46 = vld [vmem:[%s2051_s23 + $0x38] sm:$0xff] }
 0x1cd   : > { %v753_v50 = vpop.f32.mrf.mxu1 }
 0x1ce   : > { %v788_v51 = vpack.c.bf16 %v777_v48, %v776_v47  ;;  %v754_v54 = vadd.f32 %v1670_v10, %v753_v50  ;;  %v782_v62 = vmax.f32 %v762_v56, 0.0 }
 0x1cf   : > { %v1775_v53 = vpop.f32.mrf.mxu1 }
 0x1d0   : > { %v765_v55 = vadd.f32 %v1775_v53, %v1670_v10  ;;  %1788 = vmatprep.mubr.msk.bf16.mxu0 %vm478_vm1, %v788_v51  ;;  %v780_v60 = vmax.f32 %v754_v54, 0.0  ;;  %v2215_v53 = vld [vmem:[%s2051_s23 + $0x28] sm:$0xff] }
 0x1d1   : > { %v756_v57 = vpop.f32.mrf.mxu1  ;;  %1789 = vmatmul.mubr.msk.bf16.gmra.mxu0 %vm478_vm1, %v789_v52 }
 0x1d2   : > { %v757_v58 = vadd.f32 %v1670_v10, %v756_v57  ;;  %v783_v59 = vmax.f32 %v765_v55, 0.0  ;;  %v2224_v57 = vld [vmem:[%s2051_s23 + $0x50] sm:$0xff] }
 0x1d4   : > { %v781_v61 = vmax.f32 %v757_v58, 0.0  ;;  %v791_v0 = vpack.c.bf16 %v783_v59, %v782_v62 }
 0x1d6   : > { %v790_v63 = vpack.c.bf16 %v781_v61, %v780_v60 }
 0x1d8   : > { %1792 = vmatprep.mubr.msk.bf16.mxu0 %vm478_vm1, %v790_v63 }
 0x1d9   : > { %1793 = vmatmul.mubr.msk.bf16.gmra.mxu0 %vm478_vm1, %v791_v0 }
 0x281   : > { %v1782_v2 = vpop.f32.mrf.mxu0 }
 0x282   : > { %v882_v3 = vadd.f32 %v1782_v2, %v2125_v1 }
 0x283   : > { %v873_v4 = vpop.f32.mrf.mxu0 }
 0x284   : > { %1858 = vtanh.f32 %v882_v3  ;;  %v874_v5 = vadd.f32 %v2125_v1, %v873_v4  ;;  %v2249_v3 = vld [vmem:[%s2051_s23 + $0x58] sm:$0xff] }
 0x285   : > { %v1783_v6 = vpop.f32.mrf.mxu0 }
 0x286   : > { %1860 = vtanh.f32 %v874_v5  ;;  %v885_v7 = vadd.f32 %v1783_v6, %v2125_v1 }
 0x287   : > { %v876_v8 = vpop.f32.mrf.mxu0 }
 0x288   : > { %1862 = vtanh.f32 %v885_v7  ;;  %v877_v9 = vadd.f32 %v2125_v1, %v876_v8 }
 0x289   : > { %v1786_v10 = vpop.f32.mrf.mxu0 }
 0x28a   : > { %1864 = vtanh.f32 %v877_v9  ;;  %v898_v11 = vadd.f32 %v1786_v10, %v2125_v1  ;;  %v2266_v9 = vld [vmem:[%s2051_s23 + $0x48] sm:$0xff] }
 0x28b   : > { %v889_v12 = vpop.f32.mrf.mxu0 }
 0x28c   : > { %1866 = vtanh.f32 %v898_v11  ;;  %v890_v13 = vadd.f32 %v2125_v1, %v889_v12 }
 0x28d   : > { %v1787_v14 = vpop.f32.mrf.mxu0 }
 0x28e   : > { %1868 = vtanh.f32 %v890_v13  ;;  %v901_v15 = vadd.f32 %v1787_v14, %v2125_v1 }
 0x28f   : > { %v892_v16 = vpop.f32.mrf.mxu0 }
 0x290   : > { %1870 = vtanh.f32 %v901_v15  ;;  %v893_v18 = vadd.f32 %v2125_v1, %v892_v16 }
 0x291   : > { %v2138_v19 = vpop.eup %1858  ;;  %v1790_v20 = vpop.f32.mrf.mxu0 }
 0x292   : > { %1872 = vtanh.f32 %v893_v18  ;;  %v914_v21 = vadd.f32 %v1790_v20, %v2125_v1  ;;  %1132 = vrot.lane.b32.xlu1 %v2138_v19, %s1963_s13  ;;  %v2148_v23 = vsub.f32 %v2138_v19, %v2135_v17  ;;  %v954_v63 = vsub.f32 0.0, %v2138_v19 }
 0x293   : > { %v2150_v24 = vpop.eup %1860  ;;  %v905_v25 = vpop.f32.mrf.mxu0  ;;  %v1334_v18 = vmul.f32 %v2144_v22, %v2144_v22  ;;  %v1335_v20 = vmul.f32 %v2168_v32, %v2168_v32 }
 0x294   : > { %1874 = vtanh.f32 %v914_v21  ;;  %v906_v26 = vadd.f32 %v2125_v1, %v905_v25  ;;  %1128 = vrot.lane.b32.xlu0 %v2150_v24, %s1963_s13  ;;  %v2162_v30 = vsub.f32 %v2150_v24, %v2144_v22  ;;  %v952_v52 = vsub.f32 0.0, %v2150_v24 }
 0x295   : > { %v2158_v28 = vpop.eup %1862  ;;  %v1791_v29 = vpop.f32.mrf.mxu0  ;;  %v972_v7 = vmul.f32 1.442695, %v954_v63  ;;  %v1337_v63 = vmul.f32 %v2156_v27, %v2156_v27 }
 0x296   : > { %1876 = vtanh.f32 %v906_v26  ;;  %v917_v31 = vadd.f32 %v1791_v29, %v2125_v1  ;;  %1134 = vrot.lane.b32.xlu1 %v2158_v28, %s1963_s13  ;;  %v2174_v35 = vsub.f32 %v2158_v28, %v2156_v27  ;;  %v968_v62 = vmul.f32 1.442695, %v952_v52 }
 0x297   : > { %v2170_v33 = vpop.eup %1864  ;;  %v908_v34 = vpop.f32.mrf.mxu0  ;;  %v955_v11 = vsub.f32 0.0, %v2158_v28  ;;  %v1303_v26 = vsel %vm1302_vm2, %v2144_v22, 0.0  ;;  %v1304_v29 = vsel %vm1302_vm2, %v2168_v32, 0.0 }
 0x298   : > { %1878 = vtanh.f32 %v917_v31  ;;  %v909_v36 = vadd.f32 %v2125_v1, %v908_v34  ;;  %1130 = vrot.lane.b32.xlu0 %v2170_v33, %s1963_s13  ;;  %v2186_v40 = vsub.f32 %v2170_v33, %v2168_v32  ;;  %v953_v59 = vsub.f32 0.0, %v2170_v33  ;;  %v2313_v32 = vld [vmem:[%s2051_s23 + $0x68] sm:$0xff] }
 0x299   : > { %v2182_v38 = vpop.eup %1866  ;;  %v1794_v39 = vpop.f32.mrf.mxu0  ;;  %v974_v14 = vmul.f32 1.442695, %v955_v11  ;;  %v1305_v22 = vadd.f32 %v1304_v29, %v1303_v26  ;;  %v1308_v11 = vsel %vm1302_vm2, %v2156_v27, 0.0  ;;  %v1310_v27 = vsel %vm1302_vm2, %v2190_v42, 0.0 }
 0x29a   : > { %1880 = vtanh.f32 %v909_v36  ;;  %v930_v41 = vadd.f32 %v1794_v39, %v2125_v1  ;;  %v2196_v45 = vsub.f32 %v2182_v38, %v2180_v37  ;;  %v970_v4 = vmul.f32 1.442695, %v953_v59 }
 0x29b   : > { %v2192_v43 = vpop.eup %1868  ;;  %v921_v44 = vpop.f32.mrf.mxu0  ;;  %v958_v25 = vsub.f32 0.0, %v2182_v38  ;;  %v1350_v36 = vsel %vm1302_vm2, %v1334_v18, 0.0  ;;  %v1351_v39 = vsel %vm1302_vm2, %v1335_v20, 0.0  ;;  %v1355_v20 = vsel %vm1302_vm2, %v1337_v63, 0.0 }
 0x29c   : > { %1140 = vrot.lane.b32.xlu0 %v2182_v38, %s1963_s13  ;;  %v2207_v49 = vsub.f32 %v2192_v43, %v2190_v42  ;;  %1882 = vtanh.f32 %v930_v41  ;;  %v922_v50 = vadd.f32 %v2125_v1, %v921_v44  ;;  %v956_v15 = vsub.f32 0.0, %v2192_v43  ;;  %v2308_v44 = vld [vmem:[%s2051_s23 + $0x60] sm:$0xff] }
 0x29d   : > { %v2203_v47 = vpop.eup %1870  ;;  %v1795_v48 = vpop.f32.mrf.mxu0  ;;  %v1336_v41 = vmul.f32 %v2135_v17, %v2135_v17 }
 0x29e   : > { %v933_v51 = vadd.f32 %v1795_v48, %v2125_v1  ;;  %1142 = vrot.lane.b32.xlu1 %v2203_v47, %s1963_s13  ;;  %v2221_v56 = vsub.f32 %v2203_v47, %v2201_v46  ;;  %v976_v31 = vmul.f32 1.442695, %v956_v15  ;;  %v959_v52 = vsub.f32 0.0, %v2203_v47 }
 0x29f   : > { %v2217_v54 = vpop.eup %1872  ;;  %v924_v55 = vpop.f32.mrf.mxu0 }
 0x2a0   : > { %1884 = vtanh.f32 %v933_v51  ;;  %v925_v58 = vadd.f32 %v2125_v1, %v924_v55  ;;  %1136 = vrot.lane.b32.xlu0 %v2192_v43, %s1963_s13  ;;  %v2234_v61 = vsub.f32 %v2217_v54, %v2215_v53  ;;  %v2244_v1 = vld [vmem:[%s2051_s23 + $0x40] sm:$0xff]  ;;  %v1306_v51 = vsel %vm1302_vm2, %v2135_v17, 0.0 }
 0x2a1   : > { %v2230_v60 = vpop.eup %1874  ;;  %1886 = vtanh.f32 %v922_v50  ;;  %v980_v50 = vmul.f32 1.442695, %v958_v25  ;;  %v1352_v55 = vadd.f32 %v1351_v39, %v1350_v36  ;;  %v957_v15 = vsub.f32 0.0, %v2217_v54 }
 0x2a2   : > { %1138 = vrot.lane.b32.xlu1 %v2217_v54, %s1963_s13  ;;  %v2241_v0 = vsub.f32 %v2230_v60, %v2224_v57  ;;  %1888 = vtanh.f32 %v925_v58  ;;  %v1338_v25 = vmul.f32 %v2190_v42, %v2190_v42 }
 0x2a3   : > { %v2246_v2 = vpop.eup %1876  ;;  %1890 = vpow2.f32 %v968_v62  ;;  %v1353_v62 = vsel %vm1302_vm2, %v1336_v41, 0.0  ;;  %v978_v29 = vmul.f32 1.442695, %v957_v15 }
 0x2a4   : > { %1148 = vrot.lane.b32.xlu0 %v2230_v60, %s1963_s13  ;;  %v2257_v6 = vsub.f32 %v2246_v2, %v2244_v1  ;;  %1892 = vpow2.f32 %v970_v4  ;;  %v1307_v4 = vadd.f32 %v1306_v51, %v1305_v22  ;;  %v1354_v18 = vadd.f32 %v1353_v62, %v1352_v55 }
 0x2a5   : > { %v2253_v5 = vpop.eup %1878  ;;  %1894 = vpow2.f32 %v972_v7  ;;  %v1357_v41 = vsel %vm1302_vm2, %v1338_v25, 0.0  ;;  %v1340_v51 = vmul.f32 %v2180_v37, %v2180_v37  ;;  %v1339_v55 = vmul.f32 %v2215_v53, %v2215_v53 }
 0x2a6   : > { %1150 = vrot.lane.b32.xlu1 %v2253_v5, %s1963_s13  ;;  %v2263_v8 = vsub.f32 %v2253_v5, %v2249_v3  ;;  %1896 = vpow2.f32 %v974_v14  ;;  %v982_v14 = vmul.f32 1.442695, %v959_v52  ;;  %v1309_v26 = vadd.f32 %v1308_v11, %v1307_v4 }
 0x2a7   : > { %v2268_v10 = vpop.eup %1880  ;;  %1898 = vpow2.f32 %v976_v31  ;;  %v962_v31 = vsub.f32 0.0, %v2230_v60  ;;  %v1356_v36 = vadd.f32 %v1355_v20, %v1354_v18  ;;  %v1312_v52 = vsel %vm1302_vm2, %v2215_v53, 0.0 }
 0x2a8   : > { %1144 = vrot.lane.b32.xlu0 %v2246_v2, %s1963_s13  ;;  %v2275_v12 = vsub.f32 %v2268_v10, %v2266_v9  ;;  %1900 = vpow2.f32 %v980_v50  ;;  %v1314_v62 = vsel %vm1302_vm2, %v2180_v37, 0.0  ;;  %v1359_v63 = vsel %vm1302_vm2, %v1339_v55, 0.0 }
 0x2a9   : > { %v2279_v13 = vpop.eup %1882  ;;  %1902 = vpow2.f32 %v982_v14  ;;  %v988_v42 = vmul.f32 1.442695, %v962_v31  ;;  %v1358_v22 = vadd.f32 %v1357_v41, %v1356_v36  ;;  %v963_v11 = vsub.f32 0.0, %v2253_v5 }
 0x2aa   : > { %1146 = vrot.lane.b32.xlu1 %v2268_v10, %s1963_s13  ;;  %1904 = vpow2.f32 %v978_v29  ;;  %v1361_v53 = vsel %vm1302_vm2, %v1340_v51, 0.0  ;;  %v1341_v18 = vmul.f32 %v2201_v46, %v2201_v46  ;;  %v1316_v20 = vsel %vm1302_vm2, %v2201_v46, 0.0 }
 0x2ab   : > { %1906 = vpow2.f32 %v988_v42  ;;  %v1360_v14 = vadd.f32 %v1359_v63, %v1358_v22  ;;  %v961_v25 = vsub.f32 0.0, %v2268_v10  ;;  %v1342_v36 = vmul.f32 %v2244_v1, %v2244_v1 }
 0x2ac   : > { %1156 = vrot.lane.b32.xlu0 %v2279_v13, %s1963_s13  ;;  %v1363_v29 = vsel %vm1302_vm2, %v1341_v18, 0.0  ;;  %v966_v46 = vsub.f32 0.0, %v2279_v13 }
 0x2ad   : > { %v2284_v16 = vpop.eup %1884  ;;  %v986_v41 = vmul.f32 1.442695, %v961_v25 }
 0x2ae   : > { %1158 = vrot.lane.b32.xlu1 %v2284_v16, %s1963_s13  ;;  %v2292_v21 = vpop.eup %1886  ;;  %v996_v51 = vmul.f32 1.442695, %v966_v46 }
 0x2af   : > { %v2301_v34 = vpop.eup %1888  ;;  %v2324_v58 = vsub.f32 %v2292_v21, %v2308_v44 }
 0x2b0   : > { %1152 = vrot.lane.b32.xlu0 %v2292_v21, %s1963_s13  ;;  %v2315_v48 = vpop.eup %1890  ;;  %v2333_v17 = vsub.f32 %v2301_v34, %v2313_v32 }
 0x2b1   : > { %v2326_v59 = vpop.eup %1892 }
 0x2b2   : > { %1154 = vrot.lane.b32.xlu1 %v2301_v34, %s1963_s13  ;;  %v2337_v7 = vpop.eup %1894 }
 0x2b3   : > { %v2354_v39 = vpop.eup %1896 }
 0x2b4   : > { %1048 = vrot.lane.b32.xlu0 %v2315_v48, %s1964_s14  ;;  %v2362_v50 = vpop.eup %1898 }
 0x2b5   : > { %v2378_v15 = vpop.eup %1900 }
 0x2b6   : > { %1050 = vrot.lane.b32.xlu1 %v2326_v59, %s1964_s14 }
 0x2b8   : > { %1052 = vrot.lane.b32.xlu0 %v2337_v7, %s1964_s14 }
 0x2ba   : > { %1428 = vrot.lane.b32.xlu1 %v2150_v24, %s1964_s14  ;;  %v1311_v24 = vadd.f32 %v1310_v27, %v1309_v26  ;;  %v1362_v26 = vadd.f32 %v1361_v53, %v1360_v14  ;;  %v2390_v27 = vpop.eup %1902  ;;  %v965_v14 = vsub.f32 0.0, %v2301_v34 }
 0x2bb   : > { %v2402_v42 = vpop.eup %1904 }
 0x2bc   : > { %1430 = vrot.lane.b32.xlu0 %v2170_v33, %s1964_s14  ;;  %v960_v33 = vsub.f32 0.0, %v2246_v2  ;;  %v2412_v55 = vpop.eup %1906  ;;  %v994_v25 = vmul.f32 1.442695, %v965_v14  ;;  %v1696_v14 = vld [vmem:[%s2056_s26 + $0x18] sm:$0xff] }
 0x2be   : > { %1054 = vrot.lane.b32.xlu1 %v2354_v39, %s1964_s14  ;;  %v984_v4 = vmul.f32 1.442695, %v960_v33  ;;  %v1365_v33 = vsel %vm1302_vm2, %v1342_v36, 0.0  ;;  %v1326_v36 = vsel %vm1302_vm2, %v2308_v44, 0.0 }
 0x2c0   : > { %1432 = vrot.lane.b32.xlu0 %v2138_v19, %s1964_s14  ;;  %v1313_v19 = vadd.f32 %v1312_v52, %v1311_v24  ;;  %1908 = vpow2.f32 %v984_v4  ;;  %v1364_v24 = vadd.f32 %v1363_v29, %v1362_v26  ;;  %v964_v52 = vsub.f32 0.0, %v2292_v21 }
 0x2c2   : > { %1056 = vrot.lane.b32.xlu1 %v2362_v50, %s1964_s14  ;;  %v1315_v37 = vadd.f32 %v1314_v62, %v1313_v19  ;;  %v1320_v19 = vsel %vm1302_vm2, %v2266_v9, 0.0  ;;  %v1343_v62 = vmul.f32 %v2266_v9, %v2266_v9  ;;  %v992_v4 = vmul.f32 1.442695, %v964_v52 }
 0x2c3   : > { %v1345_v9 = vmul.f32 %v2249_v3, %v2249_v3 }
 0x2c4   : > { %1434 = vrot.lane.b32.xlu0 %v2158_v28, %s1964_s14  ;;  %v990_v28 = vmul.f32 1.442695, %v963_v11  ;;  %v1317_v31 = vadd.f32 %v1316_v20, %v1315_v37  ;;  %v1367_v11 = vsel %vm1302_vm2, %v1343_v62, 0.0  ;;  %v967_v20 = vsub.f32 0.0, %v2284_v16 }
 0x2c5   : > { %v1371_v26 = vsel %vm1302_vm2, %v1345_v9, 0.0 }
 0x2c6   : > { %1060 = vrot.lane.b32.xlu1 %v2378_v15, %s1964_s14  ;;  %1910 = vpow2.f32 %v990_v28  ;;  %v998_v46 = vmul.f32 1.442695, %v967_v20 }
 0x2c7   : > { %1912 = vpow2.f32 %v986_v41 }
 0x2c8   : > { %1436 = vrot.lane.b32.xlu0 %v2192_v43, %s1964_s14  ;;  %v1318_v43 = vsel %vm1302_vm2, %v2244_v1, 0.0  ;;  %v1366_v1 = vadd.f32 %v1365_v33, %v1364_v24  ;;  %1914 = vpow2.f32 %v996_v51 }
 0x2c9   : > { %v1319_v22 = vadd.f32 %v1318_v43, %v1317_v31  ;;  %1916 = vpow2.f32 %v992_v4  ;;  %v2448_v43 = vld [vmem:[%s2051_s23 + $0x70] sm:$0xff]  ;;  %v2472_v4 = vld [vmem:[%s2051_s23 + $0x78] sm:$0xff] }
 0x2ca   : > { %1062 = vrot.lane.b32.xlu1 %v2390_v27, %s1964_s14  ;;  %v1368_v18 = vadd.f32 %v1367_v11, %v1366_v1  ;;  %1918 = vpow2.f32 %v994_v25  ;;  %v1348_v41 = vmul.f32 %v2448_v43, %v2448_v43  ;;  %v1330_v52 = vsel %vm1302_vm2, %v2448_v43, 0.0 }
 0x2cb   : > { %v1321_v63 = vadd.f32 %v1320_v19, %v1319_v22  ;;  %1920 = vpow2.f32 %v998_v46 }
 0x2cc   : > { %1438 = vrot.lane.b32.xlu0 %v2217_v54, %s1964_s14  ;;  %v1344_v54 = vmul.f32 %v2224_v57, %v2224_v57  ;;  %v1377_v19 = vsel %vm1302_vm2, %v1348_v41, 0.0  ;;  %v1278_v41 = vsel %vm1208_vm3, %v2362_v50, 0.0 }
 0x2cd   : > { %v2429_v37 = vpop.eup %1908 }
 0x2ce   : > { %1058 = vrot.lane.b32.xlu1 %v2402_v42, %s1964_s14  ;;  %v1369_v53 = vsel %vm1302_vm2, %v1344_v54, 0.0 }
 0x2cf   : > { %v1370_v28 = vadd.f32 %v1369_v53, %v1368_v18  ;;  %v1698_v18 = vld [vmem:[%s2056_s26 + $0x20] sm:$0xff] }
 0x2d0   : > { %1440 = vrot.lane.b32.xlu0 %v2182_v38, %s1964_s14  ;;  %v1322_v38 = vsel %vm1302_vm2, %v2224_v57, 0.0 }
 0x2d1   : > { %v1323_v57 = vadd.f32 %v1322_v38, %v1321_v63  ;;  %v1332_v38 = vsel %vm1302_vm2, %v2472_v4, 0.0 }
 0x2d2   : > { %1068 = vrot.lane.b32.xlu1 %v2412_v55, %s1964_s14 }
 0x2d3   : > { %v2439_v29 = vpop.eup %1910 }
 0x2d4   : > { %1442 = vrot.lane.b32.xlu0 %v2203_v47, %s1964_s14  ;;  %v1324_v47 = vsel %vm1302_vm2, %v2249_v3, 0.0  ;;  %v1346_v3 = vmul.f32 %v2308_v44, %v2308_v44  ;;  %v2455_v22 = vpop.eup %1912  ;;  %v1328_v44 = vsel %vm1302_vm2, %v2313_v32, 0.0 }
 0x2d5   : > { %v1325_v31 = vadd.f32 %v1324_v47, %v1323_v57  ;;  %v2465_v1 = vpop.eup %1914 }
 0x2d6   : > { %1064 = vrot.lane.b32.xlu1 %v2429_v37, %s1964_s14  ;;  %v1373_v33 = vsel %vm1302_vm2, %v1346_v3, 0.0  ;;  %v2485_v57 = vpop.eup %1916  ;;  %v1276_v3 = vsel %vm1208_vm3, %v2354_v39, 0.0 }
 0x2d7   : > { %v1327_v24 = vadd.f32 %v1326_v36, %v1325_v31  ;;  %v2493_v25 = vpop.eup %1918 }
 0x2d8   : > { %1444 = vrot.lane.b32.xlu0 %v2246_v2, %s1964_s14  ;;  %v1372_v2 = vadd.f32 %v1371_v26, %v1370_v28  ;;  %v1271_v26 = vsel %vm1208_vm3, %v2315_v48, 0.0 }
 0x2d9   : > { %v1329_v54 = vadd.f32 %v1328_v44, %v1327_v24  ;;  %v1280_v44 = vsel %vm1208_vm3, %v2402_v42, 0.0 }
 0x2da   : > { %1070 = vrot.lane.b32.xlu1 %v2439_v29, %s1964_s14  ;;  %v1374_v51 = vadd.f32 %v1373_v33, %v1372_v2 }
 0x2dc   : > { %1446 = vrot.lane.b32.xlu0 %v2268_v10, %s1964_s14  ;;  %v1347_v10 = vmul.f32 %v2313_v32, %v2313_v32  ;;  %v1331_v32 = vadd.f32 %v1330_v52, %v1329_v54 }
 0x2de   : > { %1066 = vrot.lane.b32.xlu1 %v2455_v22, %s1964_s14  ;;  %v1375_v62 = vsel %vm1302_vm2, %v1347_v10, 0.0  ;;  %v1333_v53 = vadd.f32 %v1332_v38, %v1331_v32  ;;  %v1282_v38 = vsel %vm1208_vm3, %v2378_v15, 0.0 }
 0x2df   : > { %v1376_v63 = vadd.f32 %v1375_v62, %v1374_v51 }
 0x2e0   : > { %1448 = vrot.lane.b32.xlu0 %v2230_v60, %s1964_s14  ;;  %v1349_v60 = vmul.f32 %v2472_v4, %v2472_v4  ;;  %v1548_v47 = vadd.f32 %v1696_v14, %v1333_v53 }
 0x2e1   : > { %v1378_v11 = vadd.f32 %v1377_v19, %v1376_v63 }
 0x2e2   : > { %1076 = vrot.lane.b32.xlu1 %v2465_v1, %s1964_s14  ;;  %v1379_v9 = vsel %vm1302_vm2, %v1349_v60, 0.0  ;;  %1697 = vst.msk [vmem:[%s2056_s26 + $0x18] sm:$0xff] %vm1302_vm2, %v1548_v47 }
 0x2e3   : > { %v1380_v20 = vadd.f32 %v1379_v9, %v1378_v11 }
 0x2e4   : > { %1450 = vrot.lane.b32.xlu0 %v2253_v5, %s1964_s14  ;;  %v2501_v5 = vpop.eup %1920 }
 0x2e5   : > { %v1552_v28 = vadd.f32 %v1698_v18, %v1380_v20 }
 0x2e6   : > { %1072 = vrot.lane.b32.xlu1 %v2485_v57, %s1964_s14 }
 0x2e7   : > { %1699 = vst.msk [vmem:[%s2056_s26 + $0x20] sm:$0xff] %vm1302_vm2, %v1552_v28 }
 0x2e8   : > { %1452 = vrot.lane.b32.xlu0 %v2292_v21, %s1964_s14  ;;  %v1272_v21 = vsel %vm1208_vm3, %v2326_v59, 0.0 }
 0x2e9   : > { %v1273_v31 = vadd.f32 %v1272_v21, %v1271_v26 }
 0x2ea   : > { %1074 = vrot.lane.b32.xlu1 %v2493_v25, %s1964_s14 }
 0x2ec   : > { %1454 = vrot.lane.b32.xlu0 %v2301_v34, %s1964_s14  ;;  %v1274_v34 = vsel %vm1208_vm3, %v2337_v7, 0.0 }
 0x2ed   : > { %v1275_v36 = vadd.f32 %v1274_v34, %v1273_v31 }
 0x2ee   : > { %1078 = vrot.lane.b32.xlu1 %v2501_v5, %s1964_s14 }
 0x2ef   : > { %v1277_v46 = vadd.f32 %v1276_v3, %v1275_v36 }
 0x2f0   : > { %1456 = vrot.lane.b32.xlu0 %v2279_v13, %s1964_s14 }
 0x2f1   : > { %v1279_v33 = vadd.f32 %v1278_v41, %v1277_v46 }
 0x2f2   : > { %1458 = vrot.lane.b32.xlu1 %v2284_v16, %s1964_s14 }
 0x2f3   : > { %v1281_v19 = vadd.f32 %v1280_v44, %v1279_v33  ;;  %v1286_v44 = vsel %vm1208_vm3, %v2429_v37, 0.0 }
 0x304   : > { %v1133_v2 = vpop.permute.xlu1 %1132 }
 0x305   : > { %v1178_v10 = vmul.f32 %v2337_v7, %v1133_v2  ;;  %v1283_v7 = vadd.f32 %v1282_v38, %v1281_v19 }
 0x306   : > { %v1129_v24 = vpop.permute.xlu0 %1128 }
 0x307   : > { %v1176_v51 = vmul.f32 %v2315_v48, %v1129_v24  ;;  %v1194_v32 = vmul.f32 %v1178_v10, %v1133_v2  ;;  %v1243_v18 = vsel %vm1208_vm3, %v1178_v10, 0.0 }
 0x308   : > { %v1135_v52 = vpop.permute.xlu1 %1134 }
 0x309   : > { %v1192_v62 = vmul.f32 %v1176_v51, %v1129_v24  ;;  %v1240_v60 = vsel %vm1208_vm3, %v1176_v51, 0.0  ;;  %v1179_v11 = vmul.f32 %v2354_v39, %v1135_v52  ;;  %v1212_v26 = vsel %vm1208_vm3, %v1194_v32, 0.0 }
 0x30a   : > { %v1131_v54 = vpop.permute.xlu0 %1130  ;;  %v1284_v39 = vsel %vm1208_vm3, %v2390_v27, 0.0 }
 0x30b   : > { %v1177_v63 = vmul.f32 %v2326_v59, %v1131_v54  ;;  %v1209_v20 = vsel %vm1208_vm3, %v1192_v62, 0.0  ;;  %v1195_v31 = vmul.f32 %v1179_v11, %v1135_v52  ;;  %v1285_v3 = vadd.f32 %v1284_v39, %v1283_v7 }
 0x30c   : > { %v1245_v46 = vsel %vm1208_vm3, %v1179_v11, 0.0 }
 0x30d   : > { %v1193_v48 = vmul.f32 %v1177_v63, %v1131_v54  ;;  %v1241_v14 = vsel %vm1208_vm3, %v1177_v63, 0.0  ;;  %v1214_v10 = vsel %vm1208_vm3, %v1195_v31, 0.0 }
 0x30e   : > { %v1242_v53 = vadd.f32 %v1241_v14, %v1240_v60  ;;  %v1141_v9 = vpop.permute.xlu0 %1140 }
 0x30f   : > { %v1210_v59 = vsel %vm1208_vm3, %v1193_v48, 0.0  ;;  %v1182_v2 = vmul.f32 %v2378_v15, %v1141_v9  ;;  %v1287_v15 = vadd.f32 %v1286_v44, %v1285_v3 }
 0x310   : > { %v1211_v47 = vadd.f32 %v1210_v59, %v1209_v20  ;;  %v1244_v28 = vadd.f32 %v1243_v18, %v1242_v53  ;;  %v1143_v21 = vpop.permute.xlu1 %1142 }
 0x311   : > { %v1183_v24 = vmul.f32 %v2390_v27, %v1143_v21  ;;  %v1198_v27 = vmul.f32 %v1182_v2, %v1141_v9  ;;  %v1251_v18 = vsel %vm1208_vm3, %v1182_v2, 0.0 }
 0x312   : > { %v1213_v34 = vadd.f32 %v1212_v26, %v1211_v47  ;;  %v1137_v36 = vpop.permute.xlu0 %1136  ;;  %v1246_v33 = vadd.f32 %v1245_v46, %v1244_v28  ;;  %v1290_v46 = vsel %vm1208_vm3, %v2412_v55, 0.0 }
 0x313   : > { %v1180_v41 = vmul.f32 %v2362_v50, %v1137_v36  ;;  %v1288_v50 = vsel %vm1208_vm3, %v2455_v22, 0.0  ;;  %v1199_v48 = vmul.f32 %v1183_v24, %v1143_v21  ;;  %v1220_v26 = vsel %vm1208_vm3, %v1198_v27, 0.0 }
 0x314   : > { %v1139_v51 = vpop.permute.xlu1 %1138  ;;  %v1215_v62 = vadd.f32 %v1214_v10, %v1213_v34  ;;  %v1289_v28 = vadd.f32 %v1288_v50, %v1287_v15  ;;  %v1253_v9 = vsel %vm1208_vm3, %v1183_v24, 0.0  ;;  %v1016_v50 = vmul.f32 %v2162_v30, %v2162_v30 }
 0x315   : > { %v1196_v52 = vmul.f32 %v1180_v41, %v1137_v36  ;;  %v1247_v54 = vsel %vm1208_vm3, %v1180_v41, 0.0  ;;  %v1181_v19 = vmul.f32 %v2402_v42, %v1139_v51  ;;  %v1222_v21 = vsel %vm1208_vm3, %v1199_v48, 0.0 }
 0x316   : > { %v1248_v63 = vadd.f32 %v1247_v54, %v1246_v33  ;;  %v1149_v32 = vpop.permute.xlu0 %1148  ;;  %v1017_v27 = vmul.f32 %v2186_v40, %v2186_v40 }
 0x317   : > { %v1216_v38 = vsel %vm1208_vm3, %v1196_v52, 0.0  ;;  %v1197_v60 = vmul.f32 %v1181_v19, %v1139_v51  ;;  %v1249_v11 = vsel %vm1208_vm3, %v1181_v19, 0.0  ;;  %v1186_v31 = vmul.f32 %v2412_v55, %v1149_v32 }
 0x318   : > { %v1217_v14 = vadd.f32 %v1216_v38, %v1215_v62  ;;  %v1250_v53 = vadd.f32 %v1249_v11, %v1248_v63  ;;  %v1151_v7 = vpop.permute.xlu1 %1150  ;;  %v1291_v52 = vadd.f32 %v1290_v46, %v1289_v28  ;;  %v1296_v28 = vsel %vm1208_vm3, %v2493_v25, 0.0 }
 0x319   : > { %v1218_v42 = vsel %vm1208_vm3, %v1197_v60, 0.0  ;;  %v1187_v2 = vmul.f32 %v2439_v29, %v1151_v7 }
 0x31a   : > { %v1219_v20 = vadd.f32 %v1218_v42, %v1217_v14  ;;  %v1252_v59 = vadd.f32 %v1251_v18, %v1250_v53  ;;  %v1145_v47 = vpop.permute.xlu0 %1144 }
 0x31b   : > { %v1184_v39 = vmul.f32 %v2429_v37, %v1145_v47  ;;  %v1202_v37 = vmul.f32 %v1186_v31, %v1149_v32  ;;  %v1203_v38 = vmul.f32 %v1187_v2, %v1151_v7  ;;  %v1292_v32 = vsel %vm1208_vm3, %v2439_v29, 0.0 }
 0x31c   : > { %v1221_v34 = vadd.f32 %v1220_v26, %v1219_v20  ;;  %v1254_v36 = vadd.f32 %v1253_v9, %v1252_v59  ;;  %v1147_v3 = vpop.permute.xlu1 %1146  ;;  %v1293_v18 = vadd.f32 %v1292_v32, %v1291_v52  ;;  %v1261_v30 = vsel %vm1208_vm3, %v1187_v2, 0.0 }
 0x31d   : > { %v1200_v41 = vmul.f32 %v1184_v39, %v1145_v47  ;;  %v1255_v33 = vsel %vm1208_vm3, %v1184_v39, 0.0  ;;  %v1185_v51 = vmul.f32 %v2455_v22, %v1147_v3  ;;  %v1259_v22 = vsel %vm1208_vm3, %v1186_v31, 0.0 }
 0x31e   : > { %v1223_v24 = vadd.f32 %v1222_v21, %v1221_v34  ;;  %v1256_v44 = vadd.f32 %v1255_v33, %v1254_v36  ;;  %v1157_v10 = vpop.permute.xlu0 %1156  ;;  %v1228_v42 = vsel %vm1208_vm3, %v1202_v37, 0.0  ;;  %v1294_v7 = vsel %vm1208_vm3, %v2485_v57, 0.0 }
 0x31f   : > { %v1224_v54 = vsel %vm1208_vm3, %v1200_v41, 0.0  ;;  %v1201_v19 = vmul.f32 %v1185_v51, %v1147_v3  ;;  %v1257_v62 = vsel %vm1208_vm3, %v1185_v51, 0.0  ;;  %v1190_v14 = vmul.f32 %v2465_v1, %v1157_v10 }
 0x320   : > { %v1225_v63 = vadd.f32 %v1224_v54, %v1223_v24  ;;  %v1258_v15 = vadd.f32 %v1257_v62, %v1256_v44  ;;  %v1159_v55 = vpop.permute.xlu1 %1158  ;;  %v1230_v26 = vsel %vm1208_vm3, %v1203_v38, 0.0  ;;  %v1018_v37 = vmul.f32 %v2148_v23, %v2148_v23 }
 0x321   : > { %v1226_v60 = vsel %vm1208_vm3, %v1201_v19, 0.0  ;;  %v1191_v59 = vmul.f32 %v2501_v5, %v1159_v55  ;;  %v1206_v21 = vmul.f32 %v1190_v14, %v1157_v10 }
 0x322   : > { %v1227_v11 = vadd.f32 %v1226_v60, %v1225_v63  ;;  %v1260_v48 = vadd.f32 %v1259_v22, %v1258_v15  ;;  %v1153_v53 = vpop.permute.xlu0 %1152 }
 0x323   : > { %v1188_v40 = vmul.f32 %v2485_v57, %v1153_v53  ;;  %v1295_v57 = vadd.f32 %v1294_v7, %v1293_v18  ;;  %v1207_v51 = vmul.f32 %v1191_v59, %v1159_v55  ;;  %v1236_v38 = vsel %vm1208_vm3, %v1206_v21, 0.0 }
 0x324   : > { %v1229_v20 = vadd.f32 %v1228_v42, %v1227_v11  ;;  %v1262_v47 = vadd.f32 %v1261_v30, %v1260_v48  ;;  %v1155_v29 = vpop.permute.xlu1 %1154  ;;  %v1269_v55 = vsel %vm1208_vm3, %v1191_v59, 0.0 }
 0x325   : > { %v1204_v9 = vmul.f32 %v1188_v40, %v1153_v53  ;;  %v1263_v31 = vsel %vm1208_vm3, %v1188_v40, 0.0  ;;  %v1189_v39 = vmul.f32 %v2493_v25, %v1155_v29  ;;  %v1267_v25 = vsel %vm1208_vm3, %v1190_v14, 0.0 }
 0x326   : > { %v1231_v34 = vadd.f32 %v1230_v26, %v1229_v20  ;;  %v1264_v36 = vadd.f32 %v1263_v31, %v1262_v47  ;;  %v1049_v3 = vpop.permute.xlu0 %1048  ;;  %v1297_v22 = vadd.f32 %v1296_v28, %v1295_v57  ;;  %v1238_v32 = vsel %vm1208_vm3, %v1207_v51, 0.0 }
 0x327   : > { %v1232_v46 = vsel %vm1208_vm3, %v1204_v9, 0.0  ;;  %v1205_v2 = vmul.f32 %v1189_v39, %v1155_v29  ;;  %v1265_v41 = vsel %vm1208_vm3, %v1189_v39, 0.0  ;;  %v1096_v33 = vmul.f32 %v1049_v3, %v1016_v50 }
 0x328   : > { %v1233_v24 = vadd.f32 %v1232_v46, %v1231_v34  ;;  %v1266_v44 = vadd.f32 %v1265_v41, %v1264_v36  ;;  %v1051_v52 = vpop.permute.xlu1 %1050  ;;  %v1298_v14 = vsel %vm1208_vm3, %v2465_v1, 0.0  ;;  %v1019_v29 = vmul.f32 %v2174_v35, %v2174_v35 }
 0x329   : > { %v1234_v10 = vsel %vm1208_vm3, %v1205_v2, 0.0  ;;  %v1381_v54 = vmul.f32 -0.5, %v1096_v33  ;;  %v1097_v19 = vmul.f32 %v1051_v52, %v1017_v27  ;;  %v1299_v20 = vadd.f32 %v1298_v14, %v1297_v22 }
 0x32a   : > { %v1235_v62 = vadd.f32 %v1234_v10, %v1233_v24  ;;  %v1053_v63 = vpop.permute.xlu0 %1052  ;;  %v1268_v15 = vadd.f32 %v1267_v25, %v1266_v44  ;;  %v1300_v39 = vsel %vm1208_vm3, %v2501_v5, 0.0  ;;  %v1020_v35 = vmul.f32 %v2207_v49, %v2207_v49 }
 0x32b   : > { %v1382_v50 = vmul.f32 -0.5, %v1097_v19  ;;  %v1098_v60 = vmul.f32 %v1053_v63, %v1018_v37  ;;  %v1397_v27 = vsel %vm1302_vm2, %v1381_v54, 0.0  ;;  %v1301_v36 = vadd.f32 %v1300_v39, %v1299_v20 }
 0x32c   : > { %v1429_v11 = vpop.permute.xlu1 %1428  ;;  %v1270_v23 = vadd.f32 %v1269_v55, %v1268_v15  ;;  %v1237_v48 = vadd.f32 %v1236_v38, %v1235_v62  ;;  %v1022_v15 = vmul.f32 %v2196_v45, %v2196_v45 }
 0x32d   : > { %v1398_v53 = vsel %vm1302_vm2, %v1382_v50, 0.0  ;;  %v1383_v18 = vmul.f32 -0.5, %v1098_v60  ;;  %v1476_v42 = vadd.f32 %v1429_v11, %v1096_v33 }
 0x32e   : > { %v1399_v30 = vadd.f32 %v1398_v53, %v1397_v27  ;;  %v1431_v40 = vpop.permute.xlu0 %1430  ;;  %1533 = vrot.lane.b32.xlu1 %v1270_v23, %s1964_s14  ;;  %v1239_v7 = vadd.f32 %v1238_v32, %v1237_v48  ;;  %v1021_v32 = vmul.f32 %v2234_v61, %v2234_v61 }
 0x32f   : > { %v1400_v59 = vsel %vm1302_vm2, %v1383_v18, 0.0  ;;  %v1477_v47 = vadd.f32 %v1431_v40, %v1097_v19  ;;  %v1492_v26 = vsel %vm1302_vm2, %v1476_v42, 0.0 }
 0x330   : > { %v1401_v28 = vadd.f32 %v1400_v59, %v1399_v30  ;;  %v1055_v1 = vpop.permute.xlu1 %1054  ;;  %1525 = vrot.lane.b32.xlu0 %v1239_v7, %s1964_s14 }
 0x331   : > { %v1493_v9 = vsel %vm1302_vm2, %v1477_v47, 0.0  ;;  %v1099_v31 = vmul.f32 %v1055_v1, %v1019_v29 }
 0x332   : > { %v1494_v21 = vadd.f32 %v1493_v9, %v1492_v26  ;;  %v1433_v34 = vpop.permute.xlu0 %1432 }
 0x333   : > { %v1384_v3 = vmul.f32 -0.5, %v1099_v31  ;;  %v1478_v57 = vadd.f32 %v1433_v34, %v1098_v60  ;;  %v1023_v60 = vmul.f32 %v2221_v56, %v2221_v56 }
 0x334   : > { %v1057_v46 = vpop.permute.xlu1 %1056  ;;  %1541 = vrot.lane.b32.xlu0 %v1301_v36, %s1964_s14 }
 0x335   : > { %v1402_v2 = vsel %vm1302_vm2, %v1384_v3, 0.0  ;;  %v1495_v41 = vsel %vm1302_vm2, %v1478_v57, 0.0  ;;  %v1100_v33 = vmul.f32 %v1057_v46, %v1020_v35 }
 0x336   : > { %v1403_v51 = vadd.f32 %v1402_v2, %v1401_v28  ;;  %v1496_v24 = vadd.f32 %v1495_v41, %v1494_v21  ;;  %v1435_v44 = vpop.permute.xlu0 %1434  ;;  %v1024_v28 = vmul.f32 %v2257_v6, %v2257_v6  ;;  %v1026_v2 = vmul.f32 %v2241_v0, %v2241_v0 }
 0x337   : > { %v1385_v5 = vmul.f32 -0.5, %v1100_v33  ;;  %v1479_v52 = vadd.f32 %v1435_v44, %v1099_v31 }
 0x338   : > { %v1061_v37 = vpop.permute.xlu1 %1060 }
 0x339   : > { %v1404_v25 = vsel %vm1302_vm2, %v1385_v5, 0.0  ;;  %v1497_v10 = vsel %vm1302_vm2, %v1479_v52, 0.0  ;;  %v1102_v50 = vmul.f32 %v1061_v37, %v1022_v15  ;;  %v1027_v5 = vmul.f32 %v2263_v8, %v2263_v8 }
 0x33a   : > { %v1405_v54 = vadd.f32 %v1404_v25, %v1403_v51  ;;  %v1498_v49 = vadd.f32 %v1497_v10, %v1496_v24  ;;  %v1437_v19 = vpop.permute.xlu0 %1436  ;;  %v1025_v52 = vmul.f32 %v2275_v12, %v2275_v12  ;;  %v1014_v8 = vsub.f32 %v2279_v13, %v2448_v43 }
 0x33b   : > { %v1480_v62 = vadd.f32 %v1437_v19, %v1100_v33  ;;  %v1387_v27 = vmul.f32 -0.5, %v1102_v50 }
 0x33c   : > { %v1063_v63 = vpop.permute.xlu1 %1062 }
 0x33d   : > { %v1499_v22 = vsel %vm1302_vm2, %v1480_v62, 0.0  ;;  %v1103_v23 = vmul.f32 %v1063_v63, %v1023_v60  ;;  %v1408_v47 = vsel %vm1302_vm2, %v1387_v27, 0.0 }
 0x33e   : > { %v1500_v38 = vadd.f32 %v1499_v22, %v1498_v49  ;;  %v1439_v55 = vpop.permute.xlu0 %1438 }
 0x33f   : > { %v1388_v30 = vmul.f32 -0.5, %v1103_v23 }
 0x340   : > { %v1059_v11 = vpop.permute.xlu1 %1058 }
 0x341   : > { %v1101_v48 = vmul.f32 %v1059_v11, %v1021_v32  ;;  %v1410_v31 = vsel %vm1302_vm2, %v1388_v30, 0.0 }
 0x342   : > { %v1441_v14 = vpop.permute.xlu0 %1440 }
 0x343   : > { %v1386_v53 = vmul.f32 -0.5, %v1101_v48  ;;  %v1481_v18 = vadd.f32 %v1439_v55, %v1101_v48  ;;  %v1482_v42 = vadd.f32 %v1441_v14, %v1102_v50 }
 0x344   : > { %v1069_v45 = vpop.permute.xlu1 %1068 }
 0x345   : > { %v1406_v40 = vsel %vm1302_vm2, %v1386_v53, 0.0  ;;  %v1501_v7 = vsel %vm1302_vm2, %v1481_v18, 0.0  ;;  %v1503_v61 = vsel %vm1302_vm2, %v1482_v42, 0.0  ;;  %v1106_v44 = vmul.f32 %v1069_v45, %v1026_v2 }
 0x346   : > { %v1407_v20 = vadd.f32 %v1406_v40, %v1405_v54  ;;  %v1502_v59 = vadd.f32 %v1501_v7, %v1500_v38  ;;  %v1443_v56 = vpop.permute.xlu0 %1442  ;;  %v1030_v18 = vmul.f32 %v1014_v8, %v1014_v8  ;;  %v1015_v40 = vsub.f32 %v2284_v16, %v2472_v4 }
 0x347   : > { %v1483_v29 = vadd.f32 %v1443_v56, %v1103_v23  ;;  %v1391_v49 = vmul.f32 -0.5, %v1106_v44  ;;  %v1028_v23 = vmul.f32 %v2324_v58, %v2324_v58  ;;  %v1029_v58 = vmul.f32 %v2333_v17, %v2333_v17 }
 0x348   : > { %v1409_v1 = vadd.f32 %v1408_v47, %v1407_v20  ;;  %v1504_v26 = vadd.f32 %v1503_v61, %v1502_v59  ;;  %v1065_v9 = vpop.permute.xlu1 %1064  ;;  %v1031_v16 = vmul.f32 %v1015_v40, %v1015_v40 }
 0x349   : > { %v1505_v39 = vsel %vm1302_vm2, %v1483_v29, 0.0  ;;  %v1104_v21 = vmul.f32 %v1065_v9, %v1024_v28  ;;  %v1416_v60 = vsel %vm1302_vm2, %v1391_v49, 0.0 }
 0x34a   : > { %v1506_v34 = vadd.f32 %v1505_v39, %v1504_v26  ;;  %v1411_v36 = vadd.f32 %v1410_v31, %v1409_v1  ;;  %v1445_v3 = vpop.permute.xlu0 %1444 }
 0x34b   : > { %v1389_v57 = vmul.f32 -0.5, %v1104_v21  ;;  %v1484_v35 = vadd.f32 %v1445_v3, %v1104_v21 }
 0x34c   : > { %v1071_v46 = vpop.permute.xlu1 %1070 }
 0x34d   : > { %v1412_v41 = vsel %vm1302_vm2, %v1389_v57, 0.0  ;;  %v1507_v6 = vsel %vm1302_vm2, %v1484_v35, 0.0  ;;  %v1107_v25 = vmul.f32 %v1071_v46, %v1027_v5 }
 0x34e   : > { %v1413_v33 = vadd.f32 %v1412_v41, %v1411_v36  ;;  %v1508_v51 = vadd.f32 %v1507_v6, %v1506_v34  ;;  %v1447_v24 = vpop.permute.xlu0 %1446 }
 0x34f   : > { %v1392_v15 = vmul.f32 -0.5, %v1107_v25 }
 0x350   : > { %v1067_v37 = vpop.permute.xlu1 %1066 }
 0x351   : > { %v1105_v10 = vmul.f32 %v1067_v37, %v1025_v52  ;;  %v1418_v53 = vsel %vm1302_vm2, %v1392_v15, 0.0  ;;  %v1702_v37 = vld [vmem:[%s2056_s26 + $0x30] sm:$0xff] }
 0x352   : > { %v1449_v54 = vpop.permute.xlu0 %1448 }
 0x353   : > { %v1390_v0 = vmul.f32 -0.5, %v1105_v10  ;;  %v1485_v19 = vadd.f32 %v1447_v24, %v1105_v10  ;;  %v1486_v62 = vadd.f32 %v1449_v54, %v1106_v44 }
 0x354   : > { %v1077_v63 = vpop.permute.xlu1 %1076 }
 0x355   : > { %v1414_v22 = vsel %vm1302_vm2, %v1390_v0, 0.0  ;;  %v1509_v38 = vsel %vm1302_vm2, %v1485_v19, 0.0  ;;  %v1511_v32 = vsel %vm1302_vm2, %v1486_v62, 0.0  ;;  %v1110_v7 = vmul.f32 %v1077_v63, %v1030_v18  ;;  %v1692_v0 = vld [vmem:[%s2056_s26 + $0x8] sm:$0xff]  ;;  %v1523_v62 = vld [vmem:[%s2056_s26] sm:$0xff] }
 0x356   : > { %v1415_v55 = vadd.f32 %v1414_v22, %v1413_v33  ;;  %v1510_v50 = vadd.f32 %v1509_v38, %v1508_v51  ;;  %v1451_v12 = vpop.permute.xlu0 %1450  ;;  %v1700_v33 = vld [vmem:[%s2056_s26 + $0x28] sm:$0xff]  ;;  %v1694_v38 = vld [vmem:[%s2056_s26 + $0x10] sm:$0xff] }
 0x357   : > { %v1487_v11 = vadd.f32 %v1451_v12, %v1107_v25  ;;  %v1395_v9 = vmul.f32 -0.5, %v1110_v7 }
 0x358   : > { %v1417_v48 = vadd.f32 %v1416_v60, %v1415_v55  ;;  %v1512_v14 = vadd.f32 %v1511_v32, %v1510_v50  ;;  %v1073_v27 = vpop.permute.xlu1 %1072 }
 0x359   : > { %v1513_v42 = vsel %vm1302_vm2, %v1487_v11, 0.0  ;;  %v1108_v13 = vmul.f32 %v1073_v27, %v1028_v23  ;;  %v1424_v35 = vsel %vm1302_vm2, %v1395_v9, 0.0 }
 0x35a   : > { %v1514_v43 = vadd.f32 %v1513_v42, %v1512_v14  ;;  %v1419_v45 = vadd.f32 %v1418_v53, %v1417_v48  ;;  %v1453_v30 = vpop.permute.xlu0 %1452 }
 0x35b   : > { %v1393_v20 = vmul.f32 -0.5, %v1108_v13  ;;  %v1488_v59 = vadd.f32 %v1453_v30, %v1108_v13 }
 0x35c   : > { %v1075_v56 = vpop.permute.xlu1 %1074 }
 0x35d   : > { %v1420_v47 = vsel %vm1302_vm2, %v1393_v20, 0.0  ;;  %v1515_v61 = vsel %vm1302_vm2, %v1488_v59, 0.0  ;;  %v1109_v29 = vmul.f32 %v1075_v56, %v1029_v58 }
 0x35e   : > { %v1421_v28 = vadd.f32 %v1420_v47, %v1419_v45  ;;  %v1516_v1 = vadd.f32 %v1515_v61, %v1514_v43  ;;  %v1455_v26 = vpop.permute.xlu0 %1454 }
 0x35f   : > { %v1394_v31 = vmul.f32 -0.5, %v1109_v29  ;;  %v1489_v39 = vadd.f32 %v1455_v26, %v1109_v29 }
 0x360   : > { %v1079_v4 = vpop.permute.xlu1 %1078 }
 0x361   : > { %v1422_v21 = vsel %vm1302_vm2, %v1394_v31, 0.0  ;;  %v1517_v34 = vsel %vm1302_vm2, %v1489_v39, 0.0  ;;  %v1111_v17 = vmul.f32 %v1079_v4, %v1031_v16 }
 0x362   : > { %v1423_v36 = vadd.f32 %v1422_v21, %v1421_v28  ;;  %v1518_v3 = vadd.f32 %v1517_v34, %v1516_v1  ;;  %v1457_v57 = vpop.permute.xlu0 %1456 }
 0x363   : > { %v1396_v46 = vmul.f32 -0.5, %v1111_v17  ;;  %v1490_v2 = vadd.f32 %v1457_v57, %v1110_v7 }
 0x364   : > { %v1425_v41 = vadd.f32 %v1424_v35, %v1423_v36  ;;  %v1459_v6 = vpop.permute.xlu1 %1458 }
 0x365   : > { %v1426_v51 = vsel %vm1302_vm2, %v1396_v46, 0.0  ;;  %v1519_v24 = vsel %vm1302_vm2, %v1490_v2, 0.0  ;;  %v1491_v44 = vadd.f32 %v1459_v6, %v1111_v17 }
 0x366   : > { %v1427_v5 = vadd.f32 %v1426_v51, %v1425_v41  ;;  %v1520_v52 = vadd.f32 %v1519_v24, %v1518_v3 }
 0x367   : > { %v1521_v25 = vsel %vm1302_vm2, %v1491_v44, 0.0 }
 0x368   : > { %v1556_v10 = vadd.f32 %v1700_v33, %v1427_v5  ;;  %v1522_v54 = vadd.f32 %v1521_v25, %v1520_v52 }
 0x36a   : > { %1701 = vst.msk [vmem:[%s2056_s26 + $0x28] sm:$0xff] %vm1302_vm2, %v1556_v10  ;;  %v1560_v49 = vadd.f32 %v1702_v37, %v1522_v54 }
 0x36c   : > { %1703 = vst.msk [vmem:[%s2056_s26 + $0x30] sm:$0xff] %vm1302_vm2, %v1560_v49 }
 0x3a0   : > { %v1534_v19 = vpop.permute.xlu1 %1533 }
 0x3a1   : > { %v1536_v63 = vadd.f32 %v1692_v0, %v1534_v19 }
 0x3a2   : > { %v1526_v15 = vpop.permute.xlu0 %1525 }
 0x3a3   : > { %1693 = vst.msk [vmem:[%s2056_s26 + $0x8] sm:$0xff] %vm1302_vm2, %v1536_v63  ;;  %v1528_v22 = vadd.f32 %v1526_v15, %v1523_v62 }
 0x3a5   : > { %1529 = vst.msk [vmem:[%s2056_s26] sm:$0xff] %vm1302_vm2, %v1528_v22 }
 0x3a6   : > { %v1542_v8 = vpop.permute.xlu0 %1541 }
 0x3a7   : > { %v1544_v55 = vadd.f32 %v1694_v38, %v1542_v8 }
 0x3a9   : > { %1695 = vst.msk [vmem:[%s2056_s26 + $0x10] sm:$0xff] %vm1302_vm2, %v1544_v55 }
 0x3aa PF: > { %s18_s9 = sadd.s32 1, %s1960_s9   ;;  %s2695_s27 = smov %s1952_s29 }
 0x3ab   : > { %p15_p8 = scmp.ge.s32.totalorder %s18_s9, 8   ;;  %s2696_s28 = smov %s1956_s30 }
 0x3ac   : > { %s2697_s29 = smov %s2700_s10  ;;  %s2698_s30 = smov %s2704_s11 }
 0x3ad   :  { %17 = sbr.rel (!%p15_p8) target bundleno = 3 (0x3), region = 95 }

</bundles_post_ra>
